<compile_context>
chip_gen: v7x
topology: tpu7x:2x2x1
jax: 0.10.0
libtpu: 0.0.40
codegen_flags: <defaults>
</compile_context>

<pallas_src>
import functools

import jax
import jax.numpy as jnp
from jax.experimental import pallas as pl
from jax.experimental.pallas import tpu as pltpu


def bert_embed_kernel(tok_smem, seg_ref, word_hbm, pos_ref, segtab_ref,
                      gamma_ref, beta_ref, out_ref, wrows, dma_sem,
                      *, tile_n, chunk, seq_len, seg_vocab, unroll):
    """One grid step = `tile_n` token rows, processed in `chunk`-row slices."""
    i = pl.program_id(0)
    n_chunks = tile_n // chunk
    h = out_ref.shape[-1]

    def issue(c):
        """Start the per-row HBM gathers for chunk `c` into slot c%2."""
        slot = c % 2
        base = i * tile_n + c * chunk
        @pl.loop(0, chunk // unroll)
        def _issue(g):
            r0 = pl.multiple_of(g * unroll, unroll)
            for u in range(unroll):                      # unrolled descriptor pushes
                r = r0 + u
                tid = tok_smem[base + r]
                pltpu.make_async_copy(word_hbm.at[tid], wrows.at[slot, r],
                                      dma_sem.at[slot]).start()

    # Prime the pipeline with chunk 0.
    issue(0)

    # Hoisted small operands (avoid re-broadcasting inside the chunk loop).
    gamma = gamma_ref[...]                               # (1, H)
    beta = beta_ref[...]                                 # (1, H)
    seg0 = segtab_ref[0:1, :]                            # (1, H)
    if seg_vocab == 2:
        seg_delta = segtab_ref[1:2, :] - seg0            # (1, H)
    inv_h = 1.0 / h

    for c in range(n_chunks):
        # Prefetch the next chunk's rows into the other slot BEFORE waiting on
        # this one, so its HBM transfer hides under this chunk's compute/store.
        if c + 1 < n_chunks:
            issue(c + 1)

        slot = c % 2
        # Aggregate wait: the DMA semaphore counts bytes, so one wait sized for
        # the whole (chunk, H) slot covers all `chunk` row copies issued above.
        pltpu.make_async_copy(word_hbm.at[pl.ds(0, chunk)], wrows.at[slot],
                              dma_sem.at[slot]).wait()

        words = wrows[slot].astype(jnp.float32)          # (chunk, H)

        # Positions: chunks never straddle a sequence, so the slice is contiguous.
        pos_off = (c * chunk) % seq_len
        poss = pos_ref[pl.ds(pos_off, chunk), :]         # (chunk, H)

        # Segment embedding.
        seg_ids = seg_ref[pl.ds(c * chunk, chunk), :]    # (chunk, 1) int32
        if seg_vocab == 2:
            segs = seg0 + seg_ids.astype(jnp.float32) * seg_delta   # broadcast FMA
        else:
            segs = jnp.broadcast_to(seg0, (chunk, h))
            for k in range(1, seg_vocab):
                mask = jnp.broadcast_to(seg_ids == k, (chunk, h))
                row_k = jnp.broadcast_to(segtab_ref[k:k + 1, :], (chunk, h))
                segs = jnp.where(mask, row_k, segs)

        emb = words + poss + segs                        # (chunk, H) f32

        # Two-pass LayerNorm over the hidden dim (eps = 1e-12), f32 moments.
        mean = jnp.sum(emb, axis=-1, keepdims=True) * inv_h
        cen = emb - mean
        var = jnp.sum(cen * cen, axis=-1, keepdims=True) * inv_h
        inv = jax.lax.rsqrt(var + 1e-12)
        out_ref[pl.ds(c * chunk, chunk), :] = (cen * inv * gamma + beta).astype(out_ref.dtype)
    # TODO(synk): training-mode dropout (Bernoulli mask via pltpu.prng_*) not implemented
    # (eval-mode dropout == identity, which matches the forward-pass reference).


def bert_embeddings(token_ids, segment_ids, params, *, seqs_per_tile=None,
                    chunk_rows=None):
    """Pallas wrapper. token_ids/segment_ids: (B, S) int32. Returns (B, S, H) f32."""
    B, S = token_ids.shape
    V, H = params["word"].shape
    SV = params["seg"].shape[0]
    N = B * S

    if segment_ids is None:
        segment_ids = jnp.zeros_like(token_ids)

    # All token ids live in SMEM (scalar prefetch). 1-D SMEM pads to a power of
    # two, so guard against pathological batch sizes.
    assert N <= 262144, "token-id scalar prefetch would strain SMEM; shard the batch"

    # ---- generation-aware VMEM budget ------------------------------------
    try:
        vmem_cap = int(pltpu.get_tpu_info().vmem_capacity_bytes)
    except Exception:                                   # pragma: no cover
        vmem_cap = 64 * 1024 * 1024                     # conservative (v7x-sized)
    vmem_budget = (vmem_cap * 3) // 4                   # leave compiler headroom

    # ---- gather chunk: largest multiple-of-8 divisor of S, capped at 256 ---
    if chunk_rows is None:
        chunk_rows = S
        for c in range(8, min(S, 256) + 1, 8):
            if S % c == 0:
                chunk_rows = c
    assert S % chunk_rows == 0
    assert V >= chunk_rows, "aggregate DMA wait needs a (chunk, H) view of the table"
    unroll = 1
    for u in (8, 4, 2):
        if chunk_rows % u == 0:
            unroll = u
            break

    # ---- rows per tile: whole sequences, sized from the VMEM budget --------
    row_bytes = 2 * H * 4 + 2 * 128 * 4        # out (x2 bufs) + lane-padded seg col (x2)
    fixed = (2 * chunk_rows * H * 4            # gather ping-pong buffer
             + 2 * S * H * 4                   # position block (x2 bufs)
             + 2 * (SV + 2) * H * 4)           # seg table + gamma + beta (x2)
    max_rows = max(S, (vmem_budget // 2 - fixed) // row_bytes)

    if seqs_per_tile is None:
        want_tiles = 2 if B > 1 else 1         # keep >=2 tiles for v7x's 2 TensorCores
        seqs_per_tile = 1
        if S % 8 == 0:
            for c in range(1, B + 1):
                if B % c == 0 and c * S <= max_rows and B // c >= want_tiles:
                    seqs_per_tile = c
    assert B % seqs_per_tile == 0
    tile_n = seqs_per_tile * S
    num_tiles = N // tile_n
    assert tile_n == N or tile_n % 8 == 0, "tile rows must be sublane-aligned"

    tok_flat = token_ids.reshape(N).astype(jnp.int32)       # -> SMEM (scalar prefetch)
    seg_col = segment_ids.reshape(N, 1).astype(jnp.int32)   # -> VMEM column
    pos_tab = params["pos"][:S]                              # (S, H); NOT pre-tiled

    kernel = functools.partial(bert_embed_kernel, tile_n=tile_n, chunk=chunk_rows,
                               seq_len=S, seg_vocab=SV, unroll=unroll)

    grid_spec = pltpu.PrefetchScalarGridSpec(
        num_scalar_prefetch=1,
        grid=(num_tiles,),
        in_specs=[
            pl.BlockSpec((tile_n, 1), lambda i, tok: (i, 0)),   # segment ids
            pl.BlockSpec(memory_space=pl.ANY),                  # word table (HBM)
            pl.BlockSpec((S, H), lambda i, tok: (0, 0)),        # position table
            pl.BlockSpec((SV, H), lambda i, tok: (0, 0)),       # segment table
            pl.BlockSpec((1, H), lambda i, tok: (0, 0)),        # LayerNorm gamma
            pl.BlockSpec((1, H), lambda i, tok: (0, 0)),        # LayerNorm beta
        ],
        out_specs=pl.BlockSpec((tile_n, H), lambda i, tok: (i, 0)),
        scratch_shapes=[
            pltpu.VMEM((2, chunk_rows, H), params["word"].dtype),  # gather ping-pong
            pltpu.SemaphoreType.DMA((2,)),                         # one sem per slot
        ],
    )

    approx_vmem = fixed + tile_n * row_bytes
    vmem_limit = int(min(vmem_budget, max(16 * 1024 * 1024, 2 * approx_vmem)))

    wbytes = params["word"].dtype.itemsize
    cost = pl.CostEstimate(
        flops=int(10 * N * H),                    # adds + LayerNorm VPU work
        transcendentals=int(N),                   # one rsqrt per row
        bytes_accessed=int(N * H * (wbytes + 4) + N * 8 + S * H * 4),
    )

    out = pl.pallas_call(
        kernel,
        out_shape=jax.ShapeDtypeStruct((N, H), jnp.float32),
        grid_spec=grid_spec,
        compiler_params=pltpu.CompilerParams(
            dimension_semantics=("parallel",),    # tiles are independent (v7x megacore)
            vmem_limit_bytes=vmem_limit,
        ),
        cost_estimate=cost,
    )(tok_flat, seg_col, params["word"], pos_tab, params["seg"],
      params["gamma"], params["beta"])

    return out.reshape(B, S, H)


def init_params(key, vocab_size, hidden_size, max_position, segment_vocab_size):
    k_w, k_p, k_s = jax.random.split(key, 3)
    word = 0.02 * jax.random.normal(k_w, (vocab_size, hidden_size), jnp.float32)
    word = word.at[0].set(0.0)  # nn.Embedding padding_idx=0 -> row 0 is zeros
    pos = 0.02 * jax.random.normal(k_p, (max_position, hidden_size), jnp.float32)
    seg = 0.02 * jax.random.normal(k_s, (segment_vocab_size, hidden_size), jnp.float32)
    gamma = jnp.ones((1, hidden_size), jnp.float32)   # LayerNorm weight
    beta = jnp.zeros((1, hidden_size), jnp.float32)   # LayerNorm bias
    return {"word": word, "pos": pos, "seg": seg, "gamma": gamma, "beta": beta}


def reference(token_ids, segment_ids, params):
    B, S = token_ids.shape
    pos_ids = jnp.broadcast_to(jnp.arange(S), (B, S))
    emb = (params["word"][token_ids]
           + params["pos"][pos_ids]
           + params["seg"][segment_ids])
    mean = emb.mean(-1, keepdims=True)
    var = ((emb - mean) ** 2).mean(-1, keepdims=True)
    normed = (emb - mean) / jnp.sqrt(var + 1e-12)
    return normed * params["gamma"][0] + params["beta"][0]


if __name__ == "__main__":
    vocab_size, hidden_size = 64, 128     # H multiple of 128 keeps output stores lane-dense
    max_position, segment_vocab_size = 32, 2
    drop_rate = 0.1                       # unused at inference (dropout == identity)
    B, S = 2, 16

    key = jax.random.PRNGKey(0)
    k_param, k_tok, k_seg = jax.random.split(key, 3)

    params = init_params(k_param, vocab_size, hidden_size, max_position,
                         segment_vocab_size)
    token_ids = jax.random.randint(k_tok, (B, S), 0, vocab_size, dtype=jnp.int32)
    segment_ids = jax.random.randint(k_seg, (B, S), 0, segment_vocab_size,
                                     dtype=jnp.int32)

    # seqs_per_tile=1, chunk_rows=8 -> grid=(2,), 2 gather chunks per tile, so the
    # ping-pong DMA pipeline, aggregate wait and position slicing are exercised
    # even at toy shapes.
    out = bert_embeddings(token_ids, segment_ids, params,
                          seqs_per_tile=1, chunk_rows=8)
    out = jax.block_until_ready(out)

    ref = reference(token_ids, segment_ids, params)
    assert out.shape == (B, S, hidden_size)
    assert jnp.allclose(out, ref, atol=1e-5, rtol=1e-5), "mismatch vs reference"

    print("KERNEL_OK")
</pallas_src>

<mosaic_0001>
module attributes {stable_mosaic.version = 11 : i64} {
  func.func @bert_embed_kernel(%arg0: i32, %arg1: memref<32xi32, #tpu.memory_space<smem>>, %arg2: memref<16x1xi32, #tpu.memory_space<vmem>>, %arg3: memref<64x128xf32, #tpu.memory_space<any>>, %arg4: memref<16x128xf32, #tpu.memory_space<vmem>>, %arg5: memref<2x128xf32, #tpu.memory_space<vmem>>, %arg6: memref<1x128xf32, #tpu.memory_space<vmem>>, %arg7: memref<1x128xf32, #tpu.memory_space<vmem>>, %arg8: memref<16x128xf32, #tpu.memory_space<vmem>>, %arg9: memref<2x8x128xf32, #tpu.memory_space<vmem>>, %arg10: memref<2x!tpu.dma_semaphore, #tpu.memory_space<semaphore_mem>>) attributes {dimension_semantics = [#tpu.dimension_semantics<parallel>], iteration_bounds = array<i64: 2>, scalar_prefetch = 1 : i64, scratch_operands = 2 : i64, tpu.core_type = #tpu.core_type<tc>, window_params = [{transform_indices = @transform_0, window_bounds = array<i64: 16, 1>}, {}, {pipeline_mode = #tpu.pipeline_mode<synchronous>, transform_indices = @transform_2, window_bounds = array<i64: 16, 128>}, {pipeline_mode = #tpu.pipeline_mode<synchronous>, transform_indices = @transform_3, window_bounds = array<i64: 2, 128>}, {pipeline_mode = #tpu.pipeline_mode<synchronous>, transform_indices = @transform_4, window_bounds = array<i64: 1, 128>}, {pipeline_mode = #tpu.pipeline_mode<synchronous>, transform_indices = @transform_5, window_bounds = array<i64: 1, 128>}, {transform_indices = @transform_6, window_bounds = array<i64: 16, 128>}]} {
    %c16_i32 = arith.constant 16 : i32
    %0 = arith.muli %arg0, %c16_i32 : i32
    %c0_i32 = arith.constant 0 : i32
    %1 = arith.addi %0, %c0_i32 : i32
    %c0_i32_0 = arith.constant 0 : i32
    %c1_i32 = arith.constant 1 : i32
    %2 = arith.muli %c0_i32_0, %c1_i32 : i32
    %c0_i32_1 = arith.constant 0 : i32
    %3 = arith.addi %c0_i32_1, %2 : i32
    %c8_i32 = arith.constant 8 : i32
    %4 = arith.muli %3, %c8_i32 : i32
    %5 = tpu.assume_multiple %4, 8 : i32
    %c0_i32_2 = arith.constant 0 : i32
    %6 = arith.addi %5, %c0_i32_2 : i32
    %7 = arith.addi %1, %6 : i32
    %8 = arith.index_cast %7 : i32 to index
    %9 = memref.load %arg1[%8] : memref<32xi32, #tpu.memory_space<smem>>
    %c0_i32_3 = arith.constant 0 : i32
    %c0_i32_4 = arith.constant 0 : i32
    %c0_i32_5 = arith.constant 0 : i32
    %10 = tpu.memref_slice %arg3[%9, %c0_i32_5] : memref<64x128xf32, #tpu.memory_space<any>> -> memref<1x128xf32, #tpu.memory_space<any>>
    %11 = tpu.memref_squeeze %10 : memref<1x128xf32, #tpu.memory_space<any>> -> memref<128xf32, #tpu.memory_space<any>>
    %c0_i32_6 = arith.constant 0 : i32
    %12 = tpu.memref_slice %arg9[%c0_i32_3, %6, %c0_i32_6] : memref<2x8x128xf32, #tpu.memory_space<vmem>> -> memref<1x1x128xf32, #tpu.memory_space<vmem>>
    %13 = tpu.memref_squeeze %12 : memref<1x1x128xf32, #tpu.memory_space<vmem>> -> memref<128xf32, #tpu.memory_space<vmem>>
    %14 = tpu.memref_slice %arg10[%c0_i32_4] : memref<2x!tpu.dma_semaphore, #tpu.memory_space<semaphore_mem>> -> memref<1x!tpu.dma_semaphore, #tpu.memory_space<semaphore_mem>>
    %15 = tpu.memref_squeeze %14 : memref<1x!tpu.dma_semaphore, #tpu.memory_space<semaphore_mem>> -> memref<!tpu.dma_semaphore, #tpu.memory_space<semaphore_mem>>
    tpu.enqueue_dma source(%11 : memref<128xf32, #tpu.memory_space<any>>) target(%13 : memref<128xf32, #tpu.memory_space<vmem>>) target_semaphore(%15 : memref<!tpu.dma_semaphore, #tpu.memory_space<semaphore_mem>>)
    %c1_i32_7 = arith.constant 1 : i32
    %16 = arith.addi %5, %c1_i32_7 : i32
    %17 = arith.addi %1, %16 : i32
    %18 = arith.index_cast %17 : i32 to index
    %19 = memref.load %arg1[%18] : memref<32xi32, #tpu.memory_space<smem>>
    %c0_i32_8 = arith.constant 0 : i32
    %c0_i32_9 = arith.constant 0 : i32
    %c0_i32_10 = arith.constant 0 : i32
    %20 = tpu.memref_slice %arg3[%19, %c0_i32_10] : memref<64x128xf32, #tpu.memory_space<any>> -> memref<1x128xf32, #tpu.memory_space<any>>
    %21 = tpu.memref_squeeze %20 : memref<1x128xf32, #tpu.memory_space<any>> -> memref<128xf32, #tpu.memory_space<any>>
    %c0_i32_11 = arith.constant 0 : i32
    %22 = tpu.memref_slice %arg9[%c0_i32_8, %16, %c0_i32_11] : memref<2x8x128xf32, #tpu.memory_space<vmem>> -> memref<1x1x128xf32, #tpu.memory_space<vmem>>
    %23 = tpu.memref_squeeze %22 : memref<1x1x128xf32, #tpu.memory_space<vmem>> -> memref<128xf32, #tpu.memory_space<vmem>>
    %24 = tpu.memref_slice %arg10[%c0_i32_9] : memref<2x!tpu.dma_semaphore, #tpu.memory_space<semaphore_mem>> -> memref<1x!tpu.dma_semaphore, #tpu.memory_space<semaphore_mem>>
    %25 = tpu.memref_squeeze %24 : memref<1x!tpu.dma_semaphore, #tpu.memory_space<semaphore_mem>> -> memref<!tpu.dma_semaphore, #tpu.memory_space<semaphore_mem>>
    tpu.enqueue_dma source(%21 : memref<128xf32, #tpu.memory_space<any>>) target(%23 : memref<128xf32, #tpu.memory_space<vmem>>) target_semaphore(%25 : memref<!tpu.dma_semaphore, #tpu.memory_space<semaphore_mem>>)
    %c2_i32 = arith.constant 2 : i32
    %26 = arith.addi %5, %c2_i32 : i32
    %27 = arith.addi %1, %26 : i32
    %28 = arith.index_cast %27 : i32 to index
    %29 = memref.load %arg1[%28] : memref<32xi32, #tpu.memory_space<smem>>
    %c0_i32_12 = arith.constant 0 : i32
    %c0_i32_13 = arith.constant 0 : i32
    %c0_i32_14 = arith.constant 0 : i32
    %30 = tpu.memref_slice %arg3[%29, %c0_i32_14] : memref<64x128xf32, #tpu.memory_space<any>> -> memref<1x128xf32, #tpu.memory_space<any>>
    %31 = tpu.memref_squeeze %30 : memref<1x128xf32, #tpu.memory_space<any>> -> memref<128xf32, #tpu.memory_space<any>>
    %c0_i32_15 = arith.constant 0 : i32
    %32 = tpu.memref_slice %arg9[%c0_i32_12, %26, %c0_i32_15] : memref<2x8x128xf32, #tpu.memory_space<vmem>> -> memref<1x1x128xf32, #tpu.memory_space<vmem>>
    %33 = tpu.memref_squeeze %32 : memref<1x1x128xf32, #tpu.memory_space<vmem>> -> memref<128xf32, #tpu.memory_space<vmem>>
    %34 = tpu.memref_slice %arg10[%c0_i32_13] : memref<2x!tpu.dma_semaphore, #tpu.memory_space<semaphore_mem>> -> memref<1x!tpu.dma_semaphore, #tpu.memory_space<semaphore_mem>>
    %35 = tpu.memref_squeeze %34 : memref<1x!tpu.dma_semaphore, #tpu.memory_space<semaphore_mem>> -> memref<!tpu.dma_semaphore, #tpu.memory_space<semaphore_mem>>
    tpu.enqueue_dma source(%31 : memref<128xf32, #tpu.memory_space<any>>) target(%33 : memref<128xf32, #tpu.memory_space<vmem>>) target_semaphore(%35 : memref<!tpu.dma_semaphore, #tpu.memory_space<semaphore_mem>>)
    %c3_i32 = arith.constant 3 : i32
    %36 = arith.addi %5, %c3_i32 : i32
    %37 = arith.addi %1, %36 : i32
    %38 = arith.index_cast %37 : i32 to index
    %39 = memref.load %arg1[%38] : memref<32xi32, #tpu.memory_space<smem>>
    %c0_i32_16 = arith.constant 0 : i32
    %c0_i32_17 = arith.constant 0 : i32
    %c0_i32_18 = arith.constant 0 : i32
    %40 = tpu.memref_slice %arg3[%39, %c0_i32_18] : memref<64x128xf32, #tpu.memory_space<any>> -> memref<1x128xf32, #tpu.memory_space<any>>
    %41 = tpu.memref_squeeze %40 : memref<1x128xf32, #tpu.memory_space<any>> -> memref<128xf32, #tpu.memory_space<any>>
    %c0_i32_19 = arith.constant 0 : i32
    %42 = tpu.memref_slice %arg9[%c0_i32_16, %36, %c0_i32_19] : memref<2x8x128xf32, #tpu.memory_space<vmem>> -> memref<1x1x128xf32, #tpu.memory_space<vmem>>
    %43 = tpu.memref_squeeze %42 : memref<1x1x128xf32, #tpu.memory_space<vmem>> -> memref<128xf32, #tpu.memory_space<vmem>>
    %44 = tpu.memref_slice %arg10[%c0_i32_17] : memref<2x!tpu.dma_semaphore, #tpu.memory_space<semaphore_mem>> -> memref<1x!tpu.dma_semaphore, #tpu.memory_space<semaphore_mem>>
    %45 = tpu.memref_squeeze %44 : memref<1x!tpu.dma_semaphore, #tpu.memory_space<semaphore_mem>> -> memref<!tpu.dma_semaphore, #tpu.memory_space<semaphore_mem>>
    tpu.enqueue_dma source(%41 : memref<128xf32, #tpu.memory_space<any>>) target(%43 : memref<128xf32, #tpu.memory_space<vmem>>) target_semaphore(%45 : memref<!tpu.dma_semaphore, #tpu.memory_space<semaphore_mem>>)
    %c4_i32 = arith.constant 4 : i32
    %46 = arith.addi %5, %c4_i32 : i32
    %47 = arith.addi %1, %46 : i32
    %48 = arith.index_cast %47 : i32 to index
    %49 = memref.load %arg1[%48] : memref<32xi32, #tpu.memory_space<smem>>
    %c0_i32_20 = arith.constant 0 : i32
    %c0_i32_21 = arith.constant 0 : i32
    %c0_i32_22 = arith.constant 0 : i32
    %50 = tpu.memref_slice %arg3[%49, %c0_i32_22] : memref<64x128xf32, #tpu.memory_space<any>> -> memref<1x128xf32, #tpu.memory_space<any>>
    %51 = tpu.memref_squeeze %50 : memref<1x128xf32, #tpu.memory_space<any>> -> memref<128xf32, #tpu.memory_space<any>>
    %c0_i32_23 = arith.constant 0 : i32
    %52 = tpu.memref_slice %arg9[%c0_i32_20, %46, %c0_i32_23] : memref<2x8x128xf32, #tpu.memory_space<vmem>> -> memref<1x1x128xf32, #tpu.memory_space<vmem>>
    %53 = tpu.memref_squeeze %52 : memref<1x1x128xf32, #tpu.memory_space<vmem>> -> memref<128xf32, #tpu.memory_space<vmem>>
    %54 = tpu.memref_slice %arg10[%c0_i32_21] : memref<2x!tpu.dma_semaphore, #tpu.memory_space<semaphore_mem>> -> memref<1x!tpu.dma_semaphore, #tpu.memory_space<semaphore_mem>>
    %55 = tpu.memref_squeeze %54 : memref<1x!tpu.dma_semaphore, #tpu.memory_space<semaphore_mem>> -> memref<!tpu.dma_semaphore, #tpu.memory_space<semaphore_mem>>
    tpu.enqueue_dma source(%51 : memref<128xf32, #tpu.memory_space<any>>) target(%53 : memref<128xf32, #tpu.memory_space<vmem>>) target_semaphore(%55 : memref<!tpu.dma_semaphore, #tpu.memory_space<semaphore_mem>>)
    %c5_i32 = arith.constant 5 : i32
    %56 = arith.addi %5, %c5_i32 : i32
    %57 = arith.addi %1, %56 : i32
    %58 = arith.index_cast %57 : i32 to index
    %59 = memref.load %arg1[%58] : memref<32xi32, #tpu.memory_space<smem>>
    %c0_i32_24 = arith.constant 0 : i32
    %c0_i32_25 = arith.constant 0 : i32
    %c0_i32_26 = arith.constant 0 : i32
    %60 = tpu.memref_slice %arg3[%59, %c0_i32_26] : memref<64x128xf32, #tpu.memory_space<any>> -> memref<1x128xf32, #tpu.memory_space<any>>
    %61 = tpu.memref_squeeze %60 : memref<1x128xf32, #tpu.memory_space<any>> -> memref<128xf32, #tpu.memory_space<any>>
    %c0_i32_27 = arith.constant 0 : i32
    %62 = tpu.memref_slice %arg9[%c0_i32_24, %56, %c0_i32_27] : memref<2x8x128xf32, #tpu.memory_space<vmem>> -> memref<1x1x128xf32, #tpu.memory_space<vmem>>
    %63 = tpu.memref_squeeze %62 : memref<1x1x128xf32, #tpu.memory_space<vmem>> -> memref<128xf32, #tpu.memory_space<vmem>>
    %64 = tpu.memref_slice %arg10[%c0_i32_25] : memref<2x!tpu.dma_semaphore, #tpu.memory_space<semaphore_mem>> -> memref<1x!tpu.dma_semaphore, #tpu.memory_space<semaphore_mem>>
    %65 = tpu.memref_squeeze %64 : memref<1x!tpu.dma_semaphore, #tpu.memory_space<semaphore_mem>> -> memref<!tpu.dma_semaphore, #tpu.memory_space<semaphore_mem>>
    tpu.enqueue_dma source(%61 : memref<128xf32, #tpu.memory_space<any>>) target(%63 : memref<128xf32, #tpu.memory_space<vmem>>) target_semaphore(%65 : memref<!tpu.dma_semaphore, #tpu.memory_space<semaphore_mem>>)
    %c6_i32 = arith.constant 6 : i32
    %66 = arith.addi %5, %c6_i32 : i32
    %67 = arith.addi %1, %66 : i32
    %68 = arith.index_cast %67 : i32 to index
    %69 = memref.load %arg1[%68] : memref<32xi32, #tpu.memory_space<smem>>
    %c0_i32_28 = arith.constant 0 : i32
    %c0_i32_29 = arith.constant 0 : i32
    %c0_i32_30 = arith.constant 0 : i32
    %70 = tpu.memref_slice %arg3[%69, %c0_i32_30] : memref<64x128xf32, #tpu.memory_space<any>> -> memref<1x128xf32, #tpu.memory_space<any>>
    %71 = tpu.memref_squeeze %70 : memref<1x128xf32, #tpu.memory_space<any>> -> memref<128xf32, #tpu.memory_space<any>>
    %c0_i32_31 = arith.constant 0 : i32
    %72 = tpu.memref_slice %arg9[%c0_i32_28, %66, %c0_i32_31] : memref<2x8x128xf32, #tpu.memory_space<vmem>> -> memref<1x1x128xf32, #tpu.memory_space<vmem>>
    %73 = tpu.memref_squeeze %72 : memref<1x1x128xf32, #tpu.memory_space<vmem>> -> memref<128xf32, #tpu.memory_space<vmem>>
    %74 = tpu.memref_slice %arg10[%c0_i32_29] : memref<2x!tpu.dma_semaphore, #tpu.memory_space<semaphore_mem>> -> memref<1x!tpu.dma_semaphore, #tpu.memory_space<semaphore_mem>>
    %75 = tpu.memref_squeeze %74 : memref<1x!tpu.dma_semaphore, #tpu.memory_space<semaphore_mem>> -> memref<!tpu.dma_semaphore, #tpu.memory_space<semaphore_mem>>
    tpu.enqueue_dma source(%71 : memref<128xf32, #tpu.memory_space<any>>) target(%73 : memref<128xf32, #tpu.memory_space<vmem>>) target_semaphore(%75 : memref<!tpu.dma_semaphore, #tpu.memory_space<semaphore_mem>>)
    %c7_i32 = arith.constant 7 : i32
    %76 = arith.addi %5, %c7_i32 : i32
    %77 = arith.addi %1, %76 : i32
    %78 = arith.index_cast %77 : i32 to index
    %79 = memref.load %arg1[%78] : memref<32xi32, #tpu.memory_space<smem>>
    %c0_i32_32 = arith.constant 0 : i32
    %c0_i32_33 = arith.constant 0 : i32
    %c0_i32_34 = arith.constant 0 : i32
    %80 = tpu.memref_slice %arg3[%79, %c0_i32_34] : memref<64x128xf32, #tpu.memory_space<any>> -> memref<1x128xf32, #tpu.memory_space<any>>
    %81 = tpu.memref_squeeze %80 : memref<1x128xf32, #tpu.memory_space<any>> -> memref<128xf32, #tpu.memory_space<any>>
    %c0_i32_35 = arith.constant 0 : i32
    %82 = tpu.memref_slice %arg9[%c0_i32_32, %76, %c0_i32_35] : memref<2x8x128xf32, #tpu.memory_space<vmem>> -> memref<1x1x128xf32, #tpu.memory_space<vmem>>
    %83 = tpu.memref_squeeze %82 : memref<1x1x128xf32, #tpu.memory_space<vmem>> -> memref<128xf32, #tpu.memory_space<vmem>>
    %84 = tpu.memref_slice %arg10[%c0_i32_33] : memref<2x!tpu.dma_semaphore, #tpu.memory_space<semaphore_mem>> -> memref<1x!tpu.dma_semaphore, #tpu.memory_space<semaphore_mem>>
    %85 = tpu.memref_squeeze %84 : memref<1x!tpu.dma_semaphore, #tpu.memory_space<semaphore_mem>> -> memref<!tpu.dma_semaphore, #tpu.memory_space<semaphore_mem>>
    tpu.enqueue_dma source(%81 : memref<128xf32, #tpu.memory_space<any>>) target(%83 : memref<128xf32, #tpu.memory_space<vmem>>) target_semaphore(%85 : memref<!tpu.dma_semaphore, #tpu.memory_space<semaphore_mem>>)
    %c1_i32_36 = arith.constant 1 : i32
    %c0 = arith.constant 0 : index
    %c0_37 = arith.constant 0 : index
    %86 = vector.load %arg6[%c0, %c0_37] : memref<1x128xf32, #tpu.memory_space<vmem>>, vector<1x128xf32>
    %c0_38 = arith.constant 0 : index
    %c0_39 = arith.constant 0 : index
    %87 = vector.load %arg7[%c0_38, %c0_39] : memref<1x128xf32, #tpu.memory_space<vmem>>, vector<1x128xf32>
    %c0_40 = arith.constant 0 : index
    %c0_41 = arith.constant 0 : index
    %88 = vector.load %arg5[%c0_40, %c0_41] : memref<2x128xf32, #tpu.memory_space<vmem>>, vector<1x128xf32>
    %c1 = arith.constant 1 : index
    %c0_42 = arith.constant 0 : index
    %89 = vector.load %arg5[%c1, %c0_42] : memref<2x128xf32, #tpu.memory_space<vmem>>, vector<1x128xf32>
    %90 = arith.subf %89, %88 : vector<1x128xf32>
    %c16_i32_43 = arith.constant 16 : i32
    %91 = arith.muli %arg0, %c16_i32_43 : i32
    %c8_i32_44 = arith.constant 8 : i32
    %92 = arith.addi %91, %c8_i32_44 : i32
    %c0_i32_45 = arith.constant 0 : i32
    %c1_i32_46 = arith.constant 1 : i32
    %93 = arith.muli %c0_i32_45, %c1_i32_46 : i32
    %c0_i32_47 = arith.constant 0 : i32
    %94 = arith.addi %c0_i32_47, %93 : i32
    %c8_i32_48 = arith.constant 8 : i32
    %95 = arith.muli %94, %c8_i32_48 : i32
    %96 = tpu.assume_multiple %95, 8 : i32
    %c0_i32_49 = arith.constant 0 : i32
    %97 = arith.addi %96, %c0_i32_49 : i32
    %98 = arith.addi %92, %97 : i32
    %99 = arith.index_cast %98 : i32 to index
    %100 = memref.load %arg1[%99] : memref<32xi32, #tpu.memory_space<smem>>
    %c1_i32_50 = arith.constant 1 : i32
    %c1_i32_51 = arith.constant 1 : i32
    %c0_i32_52 = arith.constant 0 : i32
    %101 = tpu.memref_slice %arg3[%100, %c0_i32_52] : memref<64x128xf32, #tpu.memory_space<any>> -> memref<1x128xf32, #tpu.memory_space<any>>
    %102 = tpu.memref_squeeze %101 : memref<1x128xf32, #tpu.memory_space<any>> -> memref<128xf32, #tpu.memory_space<any>>
    %c0_i32_53 = arith.constant 0 : i32
    %103 = tpu.memref_slice %arg9[%c1_i32_50, %97, %c0_i32_53] : memref<2x8x128xf32, #tpu.memory_space<vmem>> -> memref<1x1x128xf32, #tpu.memory_space<vmem>>
    %104 = tpu.memref_squeeze %103 : memref<1x1x128xf32, #tpu.memory_space<vmem>> -> memref<128xf32, #tpu.memory_space<vmem>>
    %105 = tpu.memref_slice %arg10[%c1_i32_51] : memref<2x!tpu.dma_semaphore, #tpu.memory_space<semaphore_mem>> -> memref<1x!tpu.dma_semaphore, #tpu.memory_space<semaphore_mem>>
    %106 = tpu.memref_squeeze %105 : memref<1x!tpu.dma_semaphore, #tpu.memory_space<semaphore_mem>> -> memref<!tpu.dma_semaphore, #tpu.memory_space<semaphore_mem>>
    tpu.enqueue_dma source(%102 : memref<128xf32, #tpu.memory_space<any>>) target(%104 : memref<128xf32, #tpu.memory_space<vmem>>) target_semaphore(%106 : memref<!tpu.dma_semaphore, #tpu.memory_space<semaphore_mem>>)
    %c1_i32_54 = arith.constant 1 : i32
    %107 = arith.addi %96, %c1_i32_54 : i32
    %108 = arith.addi %92, %107 : i32
    %109 = arith.index_cast %108 : i32 to index
    %110 = memref.load %arg1[%109] : memref<32xi32, #tpu.memory_space<smem>>
    %c1_i32_55 = arith.constant 1 : i32
    %c1_i32_56 = arith.constant 1 : i32
    %c0_i32_57 = arith.constant 0 : i32
    %111 = tpu.memref_slice %arg3[%110, %c0_i32_57] : memref<64x128xf32, #tpu.memory_space<any>> -> memref<1x128xf32, #tpu.memory_space<any>>
    %112 = tpu.memref_squeeze %111 : memref<1x128xf32, #tpu.memory_space<any>> -> memref<128xf32, #tpu.memory_space<any>>
    %c0_i32_58 = arith.constant 0 : i32
    %113 = tpu.memref_slice %arg9[%c1_i32_55, %107, %c0_i32_58] : memref<2x8x128xf32, #tpu.memory_space<vmem>> -> memref<1x1x128xf32, #tpu.memory_space<vmem>>
    %114 = tpu.memref_squeeze %113 : memref<1x1x128xf32, #tpu.memory_space<vmem>> -> memref<128xf32, #tpu.memory_space<vmem>>
    %115 = tpu.memref_slice %arg10[%c1_i32_56] : memref<2x!tpu.dma_semaphore, #tpu.memory_space<semaphore_mem>> -> memref<1x!tpu.dma_semaphore, #tpu.memory_space<semaphore_mem>>
    %116 = tpu.memref_squeeze %115 : memref<1x!tpu.dma_semaphore, #tpu.memory_space<semaphore_mem>> -> memref<!tpu.dma_semaphore, #tpu.memory_space<semaphore_mem>>
    tpu.enqueue_dma source(%112 : memref<128xf32, #tpu.memory_space<any>>) target(%114 : memref<128xf32, #tpu.memory_space<vmem>>) target_semaphore(%116 : memref<!tpu.dma_semaphore, #tpu.memory_space<semaphore_mem>>)
    %c2_i32_59 = arith.constant 2 : i32
    %117 = arith.addi %96, %c2_i32_59 : i32
    %118 = arith.addi %92, %117 : i32
    %119 = arith.index_cast %118 : i32 to index
    %120 = memref.load %arg1[%119] : memref<32xi32, #tpu.memory_space<smem>>
    %c1_i32_60 = arith.constant 1 : i32
    %c1_i32_61 = arith.constant 1 : i32
    %c0_i32_62 = arith.constant 0 : i32
    %121 = tpu.memref_slice %arg3[%120, %c0_i32_62] : memref<64x128xf32, #tpu.memory_space<any>> -> memref<1x128xf32, #tpu.memory_space<any>>
    %122 = tpu.memref_squeeze %121 : memref<1x128xf32, #tpu.memory_space<any>> -> memref<128xf32, #tpu.memory_space<any>>
    %c0_i32_63 = arith.constant 0 : i32
    %123 = tpu.memref_slice %arg9[%c1_i32_60, %117, %c0_i32_63] : memref<2x8x128xf32, #tpu.memory_space<vmem>> -> memref<1x1x128xf32, #tpu.memory_space<vmem>>
    %124 = tpu.memref_squeeze %123 : memref<1x1x128xf32, #tpu.memory_space<vmem>> -> memref<128xf32, #tpu.memory_space<vmem>>
    %125 = tpu.memref_slice %arg10[%c1_i32_61] : memref<2x!tpu.dma_semaphore, #tpu.memory_space<semaphore_mem>> -> memref<1x!tpu.dma_semaphore, #tpu.memory_space<semaphore_mem>>
    %126 = tpu.memref_squeeze %125 : memref<1x!tpu.dma_semaphore, #tpu.memory_space<semaphore_mem>> -> memref<!tpu.dma_semaphore, #tpu.memory_space<semaphore_mem>>
    tpu.enqueue_dma source(%122 : memref<128xf32, #tpu.memory_space<any>>) target(%124 : memref<128xf32, #tpu.memory_space<vmem>>) target_semaphore(%126 : memref<!tpu.dma_semaphore, #tpu.memory_space<semaphore_mem>>)
    %c3_i32_64 = arith.constant 3 : i32
    %127 = arith.addi %96, %c3_i32_64 : i32
    %128 = arith.addi %92, %127 : i32
    %129 = arith.index_cast %128 : i32 to index
    %130 = memref.load %arg1[%129] : memref<32xi32, #tpu.memory_space<smem>>
    %c1_i32_65 = arith.constant 1 : i32
    %c1_i32_66 = arith.constant 1 : i32
    %c0_i32_67 = arith.constant 0 : i32
    %131 = tpu.memref_slice %arg3[%130, %c0_i32_67] : memref<64x128xf32, #tpu.memory_space<any>> -> memref<1x128xf32, #tpu.memory_space<any>>
    %132 = tpu.memref_squeeze %131 : memref<1x128xf32, #tpu.memory_space<any>> -> memref<128xf32, #tpu.memory_space<any>>
    %c0_i32_68 = arith.constant 0 : i32
    %133 = tpu.memref_slice %arg9[%c1_i32_65, %127, %c0_i32_68] : memref<2x8x128xf32, #tpu.memory_space<vmem>> -> memref<1x1x128xf32, #tpu.memory_space<vmem>>
    %134 = tpu.memref_squeeze %133 : memref<1x1x128xf32, #tpu.memory_space<vmem>> -> memref<128xf32, #tpu.memory_space<vmem>>
    %135 = tpu.memref_slice %arg10[%c1_i32_66] : memref<2x!tpu.dma_semaphore, #tpu.memory_space<semaphore_mem>> -> memref<1x!tpu.dma_semaphore, #tpu.memory_space<semaphore_mem>>
    %136 = tpu.memref_squeeze %135 : memref<1x!tpu.dma_semaphore, #tpu.memory_space<semaphore_mem>> -> memref<!tpu.dma_semaphore, #tpu.memory_space<semaphore_mem>>
    tpu.enqueue_dma source(%132 : memref<128xf32, #tpu.memory_space<any>>) target(%134 : memref<128xf32, #tpu.memory_space<vmem>>) target_semaphore(%136 : memref<!tpu.dma_semaphore, #tpu.memory_space<semaphore_mem>>)
    %c4_i32_69 = arith.constant 4 : i32
    %137 = arith.addi %96, %c4_i32_69 : i32
    %138 = arith.addi %92, %137 : i32
    %139 = arith.index_cast %138 : i32 to index
    %140 = memref.load %arg1[%139] : memref<32xi32, #tpu.memory_space<smem>>
    %c1_i32_70 = arith.constant 1 : i32
    %c1_i32_71 = arith.constant 1 : i32
    %c0_i32_72 = arith.constant 0 : i32
    %141 = tpu.memref_slice %arg3[%140, %c0_i32_72] : memref<64x128xf32, #tpu.memory_space<any>> -> memref<1x128xf32, #tpu.memory_space<any>>
    %142 = tpu.memref_squeeze %141 : memref<1x128xf32, #tpu.memory_space<any>> -> memref<128xf32, #tpu.memory_space<any>>
    %c0_i32_73 = arith.constant 0 : i32
    %143 = tpu.memref_slice %arg9[%c1_i32_70, %137, %c0_i32_73] : memref<2x8x128xf32, #tpu.memory_space<vmem>> -> memref<1x1x128xf32, #tpu.memory_space<vmem>>
    %144 = tpu.memref_squeeze %143 : memref<1x1x128xf32, #tpu.memory_space<vmem>> -> memref<128xf32, #tpu.memory_space<vmem>>
    %145 = tpu.memref_slice %arg10[%c1_i32_71] : memref<2x!tpu.dma_semaphore, #tpu.memory_space<semaphore_mem>> -> memref<1x!tpu.dma_semaphore, #tpu.memory_space<semaphore_mem>>
    %146 = tpu.memref_squeeze %145 : memref<1x!tpu.dma_semaphore, #tpu.memory_space<semaphore_mem>> -> memref<!tpu.dma_semaphore, #tpu.memory_space<semaphore_mem>>
    tpu.enqueue_dma source(%142 : memref<128xf32, #tpu.memory_space<any>>) target(%144 : memref<128xf32, #tpu.memory_space<vmem>>) target_semaphore(%146 : memref<!tpu.dma_semaphore, #tpu.memory_space<semaphore_mem>>)
    %c5_i32_74 = arith.constant 5 : i32
    %147 = arith.addi %96, %c5_i32_74 : i32
    %148 = arith.addi %92, %147 : i32
    %149 = arith.index_cast %148 : i32 to index
    %150 = memref.load %arg1[%149] : memref<32xi32, #tpu.memory_space<smem>>
    %c1_i32_75 = arith.constant 1 : i32
    %c1_i32_76 = arith.constant 1 : i32
    %c0_i32_77 = arith.constant 0 : i32
    %151 = tpu.memref_slice %arg3[%150, %c0_i32_77] : memref<64x128xf32, #tpu.memory_space<any>> -> memref<1x128xf32, #tpu.memory_space<any>>
    %152 = tpu.memref_squeeze %151 : memref<1x128xf32, #tpu.memory_space<any>> -> memref<128xf32, #tpu.memory_space<any>>
    %c0_i32_78 = arith.constant 0 : i32
    %153 = tpu.memref_slice %arg9[%c1_i32_75, %147, %c0_i32_78] : memref<2x8x128xf32, #tpu.memory_space<vmem>> -> memref<1x1x128xf32, #tpu.memory_space<vmem>>
    %154 = tpu.memref_squeeze %153 : memref<1x1x128xf32, #tpu.memory_space<vmem>> -> memref<128xf32, #tpu.memory_space<vmem>>
    %155 = tpu.memref_slice %arg10[%c1_i32_76] : memref<2x!tpu.dma_semaphore, #tpu.memory_space<semaphore_mem>> -> memref<1x!tpu.dma_semaphore, #tpu.memory_space<semaphore_mem>>
    %156 = tpu.memref_squeeze %155 : memref<1x!tpu.dma_semaphore, #tpu.memory_space<semaphore_mem>> -> memref<!tpu.dma_semaphore, #tpu.memory_space<semaphore_mem>>
    tpu.enqueue_dma source(%152 : memref<128xf32, #tpu.memory_space<any>>) target(%154 : memref<128xf32, #tpu.memory_space<vmem>>) target_semaphore(%156 : memref<!tpu.dma_semaphore, #tpu.memory_space<semaphore_mem>>)
    %c6_i32_79 = arith.constant 6 : i32
    %157 = arith.addi %96, %c6_i32_79 : i32
    %158 = arith.addi %92, %157 : i32
    %159 = arith.index_cast %158 : i32 to index
    %160 = memref.load %arg1[%159] : memref<32xi32, #tpu.memory_space<smem>>
    %c1_i32_80 = arith.constant 1 : i32
    %c1_i32_81 = arith.constant 1 : i32
    %c0_i32_82 = arith.constant 0 : i32
    %161 = tpu.memref_slice %arg3[%160, %c0_i32_82] : memref<64x128xf32, #tpu.memory_space<any>> -> memref<1x128xf32, #tpu.memory_space<any>>
    %162 = tpu.memref_squeeze %161 : memref<1x128xf32, #tpu.memory_space<any>> -> memref<128xf32, #tpu.memory_space<any>>
    %c0_i32_83 = arith.constant 0 : i32
    %163 = tpu.memref_slice %arg9[%c1_i32_80, %157, %c0_i32_83] : memref<2x8x128xf32, #tpu.memory_space<vmem>> -> memref<1x1x128xf32, #tpu.memory_space<vmem>>
    %164 = tpu.memref_squeeze %163 : memref<1x1x128xf32, #tpu.memory_space<vmem>> -> memref<128xf32, #tpu.memory_space<vmem>>
    %165 = tpu.memref_slice %arg10[%c1_i32_81] : memref<2x!tpu.dma_semaphore, #tpu.memory_space<semaphore_mem>> -> memref<1x!tpu.dma_semaphore, #tpu.memory_space<semaphore_mem>>
    %166 = tpu.memref_squeeze %165 : memref<1x!tpu.dma_semaphore, #tpu.memory_space<semaphore_mem>> -> memref<!tpu.dma_semaphore, #tpu.memory_space<semaphore_mem>>
    tpu.enqueue_dma source(%162 : memref<128xf32, #tpu.memory_space<any>>) target(%164 : memref<128xf32, #tpu.memory_space<vmem>>) target_semaphore(%166 : memref<!tpu.dma_semaphore, #tpu.memory_space<semaphore_mem>>)
    %c7_i32_84 = arith.constant 7 : i32
    %167 = arith.addi %96, %c7_i32_84 : i32
    %168 = arith.addi %92, %167 : i32
    %169 = arith.index_cast %168 : i32 to index
    %170 = memref.load %arg1[%169] : memref<32xi32, #tpu.memory_space<smem>>
    %c1_i32_85 = arith.constant 1 : i32
    %c1_i32_86 = arith.constant 1 : i32
    %c0_i32_87 = arith.constant 0 : i32
    %171 = tpu.memref_slice %arg3[%170, %c0_i32_87] : memref<64x128xf32, #tpu.memory_space<any>> -> memref<1x128xf32, #tpu.memory_space<any>>
    %172 = tpu.memref_squeeze %171 : memref<1x128xf32, #tpu.memory_space<any>> -> memref<128xf32, #tpu.memory_space<any>>
    %c0_i32_88 = arith.constant 0 : i32
    %173 = tpu.memref_slice %arg9[%c1_i32_85, %167, %c0_i32_88] : memref<2x8x128xf32, #tpu.memory_space<vmem>> -> memref<1x1x128xf32, #tpu.memory_space<vmem>>
    %174 = tpu.memref_squeeze %173 : memref<1x1x128xf32, #tpu.memory_space<vmem>> -> memref<128xf32, #tpu.memory_space<vmem>>
    %175 = tpu.memref_slice %arg10[%c1_i32_86] : memref<2x!tpu.dma_semaphore, #tpu.memory_space<semaphore_mem>> -> memref<1x!tpu.dma_semaphore, #tpu.memory_space<semaphore_mem>>
    %176 = tpu.memref_squeeze %175 : memref<1x!tpu.dma_semaphore, #tpu.memory_space<semaphore_mem>> -> memref<!tpu.dma_semaphore, #tpu.memory_space<semaphore_mem>>
    tpu.enqueue_dma source(%172 : memref<128xf32, #tpu.memory_space<any>>) target(%174 : memref<128xf32, #tpu.memory_space<vmem>>) target_semaphore(%176 : memref<!tpu.dma_semaphore, #tpu.memory_space<semaphore_mem>>)
    %c1_i32_89 = arith.constant 1 : i32
    %c0_i32_90 = arith.constant 0 : i32
    %c0_i32_91 = arith.constant 0 : i32
    %c0_i32_92 = arith.constant 0 : i32
    %c0_i32_93 = arith.constant 0 : i32
    %177 = tpu.memref_slice %arg3[%c0_i32_92, %c0_i32_93] : memref<64x128xf32, #tpu.memory_space<any>> -> memref<8x128xf32, #tpu.memory_space<any>>
    %c0_i32_94 = arith.constant 0 : i32
    %c0_i32_95 = arith.constant 0 : i32
    %178 = tpu.memref_slice %arg9[%c0_i32_90, %c0_i32_94, %c0_i32_95] : memref<2x8x128xf32, #tpu.memory_space<vmem>> -> memref<1x8x128xf32, #tpu.memory_space<vmem>>
    %179 = tpu.memref_squeeze %178 : memref<1x8x128xf32, #tpu.memory_space<vmem>> -> memref<8x128xf32, #tpu.memory_space<vmem>>
    %180 = tpu.memref_slice %arg10[%c0_i32_91] : memref<2x!tpu.dma_semaphore, #tpu.memory_space<semaphore_mem>> -> memref<1x!tpu.dma_semaphore, #tpu.memory_space<semaphore_mem>>
    %181 = tpu.memref_squeeze %180 : memref<1x!tpu.dma_semaphore, #tpu.memory_space<semaphore_mem>> -> memref<!tpu.dma_semaphore, #tpu.memory_space<semaphore_mem>>
    tpu.wait_dma2 semaphore(%181 : memref<!tpu.dma_semaphore, #tpu.memory_space<semaphore_mem>>) src(%177 : memref<8x128xf32, #tpu.memory_space<any>>) dst(%179 : memref<8x128xf32, #tpu.memory_space<vmem>>)
    %c0_96 = arith.constant 0 : index
    %c0_97 = arith.constant 0 : index
    %c0_98 = arith.constant 0 : index
    %182 = vector.load %arg9[%c0_96, %c0_97, %c0_98] : memref<2x8x128xf32, #tpu.memory_space<vmem>>, vector<1x8x128xf32>
    %183 = vector.shape_cast %182 : vector<1x8x128xf32> to vector<8x128xf32>
    %c0_99 = arith.constant 0 : index
    %c0_100 = arith.constant 0 : index
    %184 = vector.load %arg4[%c0_99, %c0_100] : memref<16x128xf32, #tpu.memory_space<vmem>>, vector<8x128xf32>
    %c0_101 = arith.constant 0 : index
    %c0_102 = arith.constant 0 : index
    %185 = vector.load %arg2[%c0_101, %c0_102] : memref<16x1xi32, #tpu.memory_space<vmem>>, vector<8x1xi32>
    %186 = arith.sitofp %185 : vector<8x1xi32> to vector<8x1xf32>
    %187 = vector.broadcast %186 : vector<8x1xf32> to vector<8x128xf32>
    %188 = vector.broadcast %90 : vector<1x128xf32> to vector<8x128xf32>
    %189 = arith.mulf %187, %188 : vector<8x128xf32>
    %190 = vector.broadcast %88 : vector<1x128xf32> to vector<8x128xf32>
    %191 = arith.addf %190, %189 : vector<8x128xf32>
    %192 = arith.addf %183, %184 : vector<8x128xf32>
    %193 = arith.addf %192, %191 : vector<8x128xf32>
    %cst = arith.constant dense<0.000000e+00> : vector<8xf32>
    %194 = vector.multi_reduction <add>, %193, %cst [1] : vector<8x128xf32> to vector<8xf32>
    %195 = vector.shape_cast %194 : vector<8xf32> to vector<8x1xf32>
    %cst_103 = arith.constant 7.812500e-03 : f32
    %196 = vector.broadcast %cst_103 : f32 to vector<8x1xf32>
    %197 = arith.mulf %195, %196 : vector<8x1xf32>
    %198 = vector.broadcast %197 : vector<8x1xf32> to vector<8x128xf32>
    %199 = arith.subf %193, %198 : vector<8x128xf32>
    %200 = arith.mulf %199, %199 : vector<8x128xf32>
    %cst_104 = arith.constant dense<0.000000e+00> : vector<8xf32>
    %201 = vector.multi_reduction <add>, %200, %cst_104 [1] : vector<8x128xf32> to vector<8xf32>
    %202 = vector.shape_cast %201 : vector<8xf32> to vector<8x1xf32>
    %cst_105 = arith.constant 7.812500e-03 : f32
    %203 = vector.broadcast %cst_105 : f32 to vector<8x1xf32>
    %204 = arith.mulf %202, %203 : vector<8x1xf32>
    %cst_106 = arith.constant 9.99999996E-13 : f32
    %205 = vector.broadcast %cst_106 : f32 to vector<8x1xf32>
    %206 = arith.addf %204, %205 : vector<8x1xf32>
    %207 = math.rsqrt %206 : vector<8x1xf32>
    %208 = vector.broadcast %207 : vector<8x1xf32> to vector<8x128xf32>
    %209 = arith.mulf %199, %208 : vector<8x128xf32>
    %210 = vector.broadcast %86 : vector<1x128xf32> to vector<8x128xf32>
    %211 = arith.mulf %209, %210 : vector<8x128xf32>
    %212 = vector.broadcast %87 : vector<1x128xf32> to vector<8x128xf32>
    %213 = arith.addf %211, %212 : vector<8x128xf32>
    %c0_107 = arith.constant 0 : index
    %c0_108 = arith.constant 0 : index
    %214 = vector.load %arg8[%c0_107, %c0_108] : memref<16x128xf32, #tpu.memory_space<vmem>>, vector<8x128xf32>
    tpu.vector_store %arg8[%c0_107, %c0_108], %213 {strides = array<i32>} : memref<16x128xf32, #tpu.memory_space<vmem>>, vector<8x128xf32>,
    %c1_i32_109 = arith.constant 1 : i32
    %c1_i32_110 = arith.constant 1 : i32
    %c0_i32_111 = arith.constant 0 : i32
    %c0_i32_112 = arith.constant 0 : i32
    %215 = tpu.memref_slice %arg3[%c0_i32_111, %c0_i32_112] : memref<64x128xf32, #tpu.memory_space<any>> -> memref<8x128xf32, #tpu.memory_space<any>>
    %c0_i32_113 = arith.constant 0 : i32
    %c0_i32_114 = arith.constant 0 : i32
    %216 = tpu.memref_slice %arg9[%c1_i32_109, %c0_i32_113, %c0_i32_114] : memref<2x8x128xf32, #tpu.memory_space<vmem>> -> memref<1x8x128xf32, #tpu.memory_space<vmem>>
    %217 = tpu.memref_squeeze %216 : memref<1x8x128xf32, #tpu.memory_space<vmem>> -> memref<8x128xf32, #tpu.memory_space<vmem>>
    %218 = tpu.memref_slice %arg10[%c1_i32_110] : memref<2x!tpu.dma_semaphore, #tpu.memory_space<semaphore_mem>> -> memref<1x!tpu.dma_semaphore, #tpu.memory_space<semaphore_mem>>
    %219 = tpu.memref_squeeze %218 : memref<1x!tpu.dma_semaphore, #tpu.memory_space<semaphore_mem>> -> memref<!tpu.dma_semaphore, #tpu.memory_space<semaphore_mem>>
    tpu.wait_dma2 semaphore(%219 : memref<!tpu.dma_semaphore, #tpu.memory_space<semaphore_mem>>) src(%215 : memref<8x128xf32, #tpu.memory_space<any>>) dst(%217 : memref<8x128xf32, #tpu.memory_space<vmem>>)
    %c1_115 = arith.constant 1 : index
    %c0_116 = arith.constant 0 : index
    %c0_117 = arith.constant 0 : index
    %220 = vector.load %arg9[%c1_115, %c0_116, %c0_117] : memref<2x8x128xf32, #tpu.memory_space<vmem>>, vector<1x8x128xf32>
    %221 = vector.shape_cast %220 : vector<1x8x128xf32> to vector<8x128xf32>
    %c8 = arith.constant 8 : index
    %c0_118 = arith.constant 0 : index
    %222 = vector.load %arg4[%c8, %c0_118] : memref<16x128xf32, #tpu.memory_space<vmem>>, vector<8x128xf32>
    %c8_119 = arith.constant 8 : index
    %c0_120 = arith.constant 0 : index
    %223 = vector.load %arg2[%c8_119, %c0_120] : memref<16x1xi32, #tpu.memory_space<vmem>>, vector<8x1xi32>
    %224 = arith.sitofp %223 : vector<8x1xi32> to vector<8x1xf32>
    %225 = vector.broadcast %224 : vector<8x1xf32> to vector<8x128xf32>
    %226 = vector.broadcast %90 : vector<1x128xf32> to vector<8x128xf32>
    %227 = arith.mulf %225, %226 : vector<8x128xf32>
    %228 = vector.broadcast %88 : vector<1x128xf32> to vector<8x128xf32>
    %229 = arith.addf %228, %227 : vector<8x128xf32>
    %230 = arith.addf %221, %222 : vector<8x128xf32>
    %231 = arith.addf %230, %229 : vector<8x128xf32>
    %cst_121 = arith.constant dense<0.000000e+00> : vector<8xf32>
    %232 = vector.multi_reduction <add>, %231, %cst_121 [1] : vector<8x128xf32> to vector<8xf32>
    %233 = vector.shape_cast %232 : vector<8xf32> to vector<8x1xf32>
    %cst_122 = arith.constant 7.812500e-03 : f32
    %234 = vector.broadcast %cst_122 : f32 to vector<8x1xf32>
    %235 = arith.mulf %233, %234 : vector<8x1xf32>
    %236 = vector.broadcast %235 : vector<8x1xf32> to vector<8x128xf32>
    %237 = arith.subf %231, %236 : vector<8x128xf32>
    %238 = arith.mulf %237, %237 : vector<8x128xf32>
    %cst_123 = arith.constant dense<0.000000e+00> : vector<8xf32>
    %239 = vector.multi_reduction <add>, %238, %cst_123 [1] : vector<8x128xf32> to vector<8xf32>
    %240 = vector.shape_cast %239 : vector<8xf32> to vector<8x1xf32>
    %cst_124 = arith.constant 7.812500e-03 : f32
    %241 = vector.broadcast %cst_124 : f32 to vector<8x1xf32>
    %242 = arith.mulf %240, %241 : vector<8x1xf32>
    %cst_125 = arith.constant 9.99999996E-13 : f32
    %243 = vector.broadcast %cst_125 : f32 to vector<8x1xf32>
    %244 = arith.addf %242, %243 : vector<8x1xf32>
    %245 = math.rsqrt %244 : vector<8x1xf32>
    %246 = vector.broadcast %245 : vector<8x1xf32> to vector<8x128xf32>
    %247 = arith.mulf %237, %246 : vector<8x128xf32>
    %248 = vector.broadcast %86 : vector<1x128xf32> to vector<8x128xf32>
    %249 = arith.mulf %247, %248 : vector<8x128xf32>
    %250 = vector.broadcast %87 : vector<1x128xf32> to vector<8x128xf32>
    %251 = arith.addf %249, %250 : vector<8x128xf32>
    %c8_126 = arith.constant 8 : index
    %c0_127 = arith.constant 0 : index
    %252 = vector.load %arg8[%c8_126, %c0_127] : memref<16x128xf32, #tpu.memory_space<vmem>>, vector<8x128xf32>
    tpu.vector_store %arg8[%c8_126, %c0_127], %251 {strides = array<i32>} : memref<16x128xf32, #tpu.memory_space<vmem>>, vector<8x128xf32>,
    return
  }
  func.func @transform_0(%arg0: i32, %arg1: memref<32xi32, #tpu.memory_space<smem>>) -> (i32, i32) {
    %c0_i32 = arith.constant 0 : i32
    %c0_i32_0 = arith.constant 0 : i32
    return %arg0, %c0_i32 : i32, i32
  }
  func.func @transform_2(%arg0: i32, %arg1: memref<32xi32, #tpu.memory_space<smem>>) -> (i32, i32) {
    %c0_i32 = arith.constant 0 : i32
    %c0_i32_0 = arith.constant 0 : i32
    %c0_i32_1 = arith.constant 0 : i32
    return %c0_i32, %c0_i32_0 : i32, i32
  }
  func.func @transform_3(%arg0: i32, %arg1: memref<32xi32, #tpu.memory_space<smem>>) -> (i32, i32) {
    %c0_i32 = arith.constant 0 : i32
    %c0_i32_0 = arith.constant 0 : i32
    %c0_i32_1 = arith.constant 0 : i32
    return %c0_i32, %c0_i32_0 : i32, i32
  }
  func.func @transform_4(%arg0: i32, %arg1: memref<32xi32, #tpu.memory_space<smem>>) -> (i32, i32) {
    %c0_i32 = arith.constant 0 : i32
    %c0_i32_0 = arith.constant 0 : i32
    %c0_i32_1 = arith.constant 0 : i32
    return %c0_i32, %c0_i32_0 : i32, i32
  }
  func.func @transform_5(%arg0: i32, %arg1: memref<32xi32, #tpu.memory_space<smem>>) -> (i32, i32) {
    %c0_i32 = arith.constant 0 : i32
    %c0_i32_0 = arith.constant 0 : i32
    %c0_i32_1 = arith.constant 0 : i32
    return %c0_i32, %c0_i32_0 : i32, i32
  }
  func.func @transform_6(%arg0: i32, %arg1: memref<32xi32, #tpu.memory_space<smem>>) -> (i32, i32) {
    %c0_i32 = arith.constant 0 : i32
    %c0_i32_0 = arith.constant 0 : i32
    return %arg0, %c0_i32 : i32, i32
  }
}

</mosaic_0001>

<bundles_post_ra>
// kernel: tpu_custom_call.1
= control target key start
LH: loop header
LB: loop body
LE: loop exit
PB: predicated region body
PF: predicated region fallthrough
CT: control target
= control target key end

     0   :  { %s1787_s0 = inlined_call_operand.vmem [shape: s32[32], index: 0, kind: input, shape index: {}]   ;;  %s1788_s1 = inlined_call_operand.vmem [shape: s32[32,1], index: 1, kind: input, shape index: {}]   ;;  %s1789_s2 = inlined_call_operand.hbm [shape: f32[64,128], index: 2, kind: input, shape index: {}]   ;;  %s1790_s3 = inlined_call_operand.vmem [shape: f32[16,128], index: 3, kind: input, shape index: {}]   ;;  %s1791_s4 = inlined_call_operand.vmem [shape: f32[2,128], index: 4, kind: input, shape index: {}]   ;;  %s1792_s5 = inlined_call_operand.vmem [shape: f32[1,128], index: 5, kind: input, shape index: {}]   ;;  %s1793_s6 = inlined_call_operand.vmem [shape: f32[1,128], index: 6, kind: input, shape index: {}]   ;;  %s1794_s7 = inlined_call_operand.hbm [shape: f32[32,128], index: 7, kind: output, shape index: {}]  }
   0x1   :  { %1800 = sst [smem:[#allocation50_spill]] %s1788_s1  ;;  %s12_s26 = sshll.u32 %s1787_s0, 4  ;;  %s13_s26 = int_to_ptr.vmem [resolvable:$true] %s12_s26 }
   0x2   :  { %1801 = sst [smem:[#allocation51_spill]] %s1791_s4  ;;  %s827_s27 = scalar_lea.vmem %s13_s26, 16 }
   0x3   :  { %1802 = sst [smem:[#allocation52_spill]] %s1792_s5  ;;  %p828_p0 = scmp.ne.s32.totalorder %s13_s26, %s827_s27 }
   0x4   :  { %1803 = sst [smem:[#allocation53_spill]] %s1793_s6  ;;  %p832_p1 = scmp.lt.s32.totalorder %s13_s26, %s13_s26 }
   0x5   :  { %p833_p2 = scmp.lt.s32.totalorder %s827_s27, %s827_s27 }
   0x7   :  { %p834_p3 = por %p833_p2, %p832_p1 }
   0x9   :  { %p835_p4 = pnand %p834_p3, %p828_p0 }
   0xb   :  { %838 = shalt.err (!%p835_p4)  }
   0xc   :  { %s1293_s28 = smov [#allocation5]  }
   0xd   :  { %15 = dma.vmem_to_smem %s13_s26, 16, %s1293_s28, [#allocation4] }
   0xe   :  { %1267 = dma.done.wait [#allocation4], 16 }
   0xf   :  { %1268 = vsyncadd [#allocation4], 4294967280 }
  0x10   :  { %17 = sfence }
  0x11   :  { %18 = vsyncpa [#allocation7], 0 }
  0x12   :  { %20 = vsyncpa [#allocation7 + $0x1], 0  ;;  %s1357_s29 = smov 0   ;;  %s1359_s30 = smov 0  }
  0x13   :  { %s1361_s0 = smov 0   ;;  %s1363_s8 = smov 0  }
  0x14 LB: > { %1804 = sst [smem:[#allocation46_spill]] %s1287_s0  ;;  %s1378_s9 = sadd.s32 4294967295, %s1291_s8   ;;  %s1291_s8 = sphi %s1363_s8, %s1816_s8   ;;  %s1287_s0 = sphi %s1361_s0, %s1818_s0   ;;  %s1283_s30 = sphi %s1359_s30, %s1820_s30   ;;  %s1279_s29 = sphi %s1357_s29, %s1819_s29  }
  0x15   : > { %s728_s10 = sadd.s32 4294967294, %s1291_s8   ;;  %s1382_s11 = sadd.s32 1, %s1291_s8  }
  0x16   : > { %1805 = sst [smem:[#allocation47_spill]] %s1382_s11  ;;  %s143_s12 = sadd.s32 1, %s1287_s0 }
  0x17   : > { %s140_s13 = ssub.s32 %s1291_s8, %s1382_s11  ;;  %p153_p5 = scmp.ne.s32.totalorder %s1287_s0, %s1283_s30 }
  0x18   : > { %p141_p6 = scmp.eq.s32.totalorder %s140_s13, 0  ;;  %p154_p7 = scmp.eq.s32.totalorder %s1378_s9, 1 }
  0x19   : > { %p159_p8 = scmp.ne.s32.totalorder %s1283_s30, %s1279_s29  ;;  %p160_p9 = scmp.eq.s32.totalorder %s728_s10, 1 }
  0x1a   : > { %s1393_s14 = scalar_select %p141_p6, %s1287_s0, %s143_s12  }
  0x1b   : > { %p1395_p10 = por %p154_p7, %p153_p5  ;;  %p1399_p11 = por %p160_p9, %p159_p8 }
  0x1c   : > { %1806 = sst [smem:[#allocation48_spill]] %s1393_s14  ;;  %p731_p12 = scmp.ge.s32.totalorder %s1291_s8, 1 }
  0x1d   : > { %s1808_s16 = scalar_select %p1399_p11, 1, 0 }
  0x1e   : > { %p199_p13 = scmp.lt.s32.totalorder %s1291_s8, 3 }
  0x1f   : > { %1809 = sst [smem:[#allocation49_spill]] %s1808_s16 }
  0x20   : > { %p200_p0 = pnand %p731_p12, %p199_p13 }
  0x21   : > { %s1795_s17 = sand.u32 (!%p200_p0), 1, %s1283_s30   ;;  %s733_s18 = sshll.u32 (!%p200_p0), %s1378_s9, 1 }
  0x22   : > { %203 = sbr.rel (%p200_p0) target bundleno = 1315 (0x523), region = 40  ;;  %s1810_s5 = sld [smem:[#allocation52_spill]] (!%p200_p0) }
  0x23   : > { %s1811_s6 = sld [smem:[#allocation53_spill]] (!%p200_p0)  ;;  %s1419_s23 = sshll.u32 (!%p200_p0), %s1795_s17, 4 }
  0x24   : > { %p228_p1 = scmp.lt.s32.totalorder (!%p200_p0), %s733_s18, 3  ;;  %s1812_s4 = sld [smem:[#allocation51_spill]] (!%p200_p0) }
  0x25   : > { %s1432_s28 = sshll.u32 (!%p200_p0), %s1378_s9, 4  ;;  %s1294_s13 = smov (!%p200_p0), [#allocation2]  }
  0x26   : > { %s236_s10 = sld [smem:[#allocation5 + %s1432_s28]] (!%p200_p0)  ;;  %s246_s19 = sshll.u32 (!%p200_p0), %s1294_s13, 4  ;;  %s1442_s19 = int_to_ptr.vmem [resolvable:$true] %s246_s19 }
  0x27   : > { %s1813_s1 = sld [smem:[#allocation50_spill]] (!%p200_p0)  ;;  %s251_s24 = sadd.s32 (!%p200_p0), 1, %s1432_s28 }
  0x28   : > { %v1410_v0 = vld [vmem:[%s1810_s5] ss:$0 sm:$0xff] (!%p200_p0)  ;;  %s1445_s25 = sld [smem:[#allocation5 + %s251_s24]] (!%p200_p0)  ;;  %s1295_s26 = smov (!%p200_p0), [#allocation2 + $0x1]  }
  0x29   : > { %v1415_v1 = vld [vmem:[%s1811_s6] ss:$0 sm:$0xff]  ;;  %s1822_s18 = smov (!%p228_p1, %s733_s18), 3  ;;  %s263_s27 = sshll.u32 %s1295_s26, 4  ;;  %s1447_s27 = int_to_ptr.vmem [resolvable:$true] %s263_s27 }
  0x2a   : > { %v1424_v2 = vld [vmem:[%s1812_s4] sm:$0x1]  ;;  %v1429_v3 = vld [vmem:[%s1812_s4 + $0x1] sm:$0x1]  ;;  %s734_s12 = sshll.u32 %s1822_s18, 3  ;;  %s268_s17 = sadd.s32 2, %s1432_s28 }
  0x2b   : > { %v373_v4 = vsub.f32 %v1429_v3, %v1424_v2  ;;  %s1450_s5 = sld [smem:[#allocation5 + %s268_s17]] }
  0x2c   : > { %s736_s4 = sshll.u32 %s236_s10, 4 }
  0x2d   : > { %s1440_s22 = scalar_lea.vmem %s1813_s1, %s734_s12  ;;  %s238_s6 = scalar_lea.hbm %s1789_s2, %s736_s4 }
  0x2e   : > { %s839_s20 = scalar_lea.hbm %s238_s6, 16  ;;  %s1458_s1 = scalar_lea.hbm %s1789_s2, 1024 }
  0x2f   : > { %p840_p2 = scmp.ne.s32.totalorder %s238_s6, %s839_s20  ;;  %p842_p3 = scmp.lt.u32.totalorder %s238_s6, %s1789_s2 }
  0x30   : > { %p843_p4 = scmp.lt.u32.totalorder %s1458_s1, %s839_s20  ;;  %p845_p6 = scmp.lt.u32.totalorder %s839_s20, %s238_s6 }
  0x32   : > { %p844_p5 = por %p843_p4, %p842_p3 }
  0x34   : > { %p846_p7 = por %p845_p6, %p844_p5 }
  0x36   : > { %p847_p8 = pnand %p846_p7, %p840_p2 }
  0x38   : > { %850 = shalt.err (!%p847_p8)  }
  0x39   : > { %s851_s4 = scalar_lea.vmem %s1442_s19, 16  ;;  %s1467_s17 = scalar_lea.vmem %s1442_s19, 256 }
  0x3a   : > { %p852_p9 = scmp.ne.s32.totalorder %s1442_s19, %s851_s4  ;;  %p856_p12 = scmp.lt.s32.totalorder %s1442_s19, %s1442_s19 }
  0x3b   : > { %p857_p13 = scmp.lt.s32.totalorder %s1467_s17, %s851_s4 }
  0x3d   : > { %p858_p0 = por %p857_p13, %p856_p12 }
  0x3f   : > { %p859_p1 = pnand %p858_p0, %p852_p9 }
  0x41   : > { %862 = shalt.err (!%p859_p1)  }
  0x42   : > { %249 = dma.hbm_to_vmem [thread:$0]  %s238_s6, 16, %s1442_s19, [#allocation3] }
  0x43   : > { %s1296_s14 = smov [#allocation2 + $0x2]   ;;  %s285_s26 = sadd.s32 3, %s1432_s28 }
  0x44   : > { %s280_s10 = sshll.u32 %s1296_s14, 4  ;;  %s737_s18 = sshll.u32 %s1445_s25, 4  ;;  %s1475_s10 = int_to_ptr.vmem [resolvable:$true] %s280_s10 }
  0x45   : > { %s254_s12 = scalar_lea.hbm %s1789_s2, %s737_s18  ;;  %s1480_s21 = sld [smem:[#allocation5 + %s285_s26]] }
  0x46   : > { %s863_s24 = scalar_lea.hbm %s254_s12, 16  ;;  %p866_p3 = scmp.lt.u32.totalorder %s254_s12, %s1789_s2 }
  0x47   : > { %p864_p2 = scmp.ne.s32.totalorder %s254_s12, %s863_s24  ;;  %p867_p4 = scmp.lt.u32.totalorder %s1458_s1, %s863_s24 }
  0x48   : > { %p869_p6 = scmp.lt.u32.totalorder %s863_s24, %s254_s12 }
  0x49   : > { %p868_p5 = por %p867_p4, %p866_p3 }
  0x4b   : > { %p870_p7 = por %p869_p6, %p868_p5 }
  0x4d   : > { %p871_p8 = pnand %p870_p7, %p864_p2 }
  0x4f   : > { %874 = shalt.err (!%p871_p8)  }
  0x50   : > { %s875_s6 = scalar_lea.vmem %s1447_s27, 16  ;;  %p880_p12 = scmp.lt.s32.totalorder %s1447_s27, %s1442_s19 }
  0x51   : > { %p876_p9 = scmp.ne.s32.totalorder %s1447_s27, %s875_s6  ;;  %p881_p13 = scmp.lt.s32.totalorder %s1467_s17, %s875_s6 }
  0x53   : > { %p882_p0 = por %p881_p13, %p880_p12 }
  0x55   : > { %p883_p1 = pnand %p882_p0, %p876_p9 }
  0x57   : > { %886 = shalt.err (!%p883_p1)  }
  0x58   : > { %266 = dma.hbm_to_vmem [thread:$0]  %s254_s12, 16, %s1447_s27, [#allocation3] }
  0x59   : > { %s738_s0 = sshll.u32 %s1450_s5, 4  ;;  %s1297_s18 = smov [#allocation2 + $0x3]  }
  0x5a   : > { %s271_s26 = scalar_lea.hbm %s1789_s2, %s738_s0  ;;  %s297_s13 = sshll.u32 %s1297_s18, 4  ;;  %s298_s13 = int_to_ptr.vmem [resolvable:$true] %s297_s13 }
  0x5b   : > { %s887_s20 = scalar_lea.hbm %s271_s26, 16  ;;  %p890_p3 = scmp.lt.u32.totalorder %s271_s26, %s1789_s2 }
  0x5c   : > { %p888_p2 = scmp.ne.s32.totalorder %s271_s26, %s887_s20  ;;  %p891_p4 = scmp.lt.u32.totalorder %s1458_s1, %s887_s20 }
  0x5d   : > { %p893_p6 = scmp.lt.u32.totalorder %s887_s20, %s271_s26 }
  0x5e   : > { %p892_p5 = por %p891_p4, %p890_p3 }
  0x60   : > { %p894_p7 = por %p893_p6, %p892_p5 }
  0x62   : > { %p895_p8 = pnand %p894_p7, %p888_p2 }
  0x64   : > { %898 = shalt.err (!%p895_p8)  }
  0x65   : > { %s899_s5 = scalar_lea.vmem %s1475_s10, 16  ;;  %p904_p12 = scmp.lt.s32.totalorder %s1475_s10, %s1442_s19 }
  0x66   : > { %p900_p9 = scmp.ne.s32.totalorder %s1475_s10, %s899_s5  ;;  %p905_p13 = scmp.lt.s32.totalorder %s1467_s17, %s899_s5 }
  0x68   : > { %p906_p0 = por %p905_p13, %p904_p12 }
  0x6a   : > { %p907_p1 = pnand %p906_p0, %p900_p9 }
  0x6c   : > { %910 = shalt.err (!%p907_p1)  }
  0x6d   : > { %283 = dma.hbm_to_vmem [thread:$0]  %s271_s26, 16, %s1475_s10, [#allocation3] }
  0x6e   : > { %s302_s27 = sadd.s32 4, %s1432_s28  ;;  %s739_s12 = sshll.u32 %s1480_s21, 4 }
  0x6f   : > { %s1508_s6 = sld [smem:[#allocation5 + %s302_s27]]  ;;  %s288_s14 = scalar_lea.hbm %s1789_s2, %s739_s12 }
  0x70   : > { %s911_s18 = scalar_lea.hbm %s288_s14, 16  ;;  %p914_p3 = scmp.lt.u32.totalorder %s288_s14, %s1789_s2 }
  0x71   : > { %p912_p2 = scmp.ne.s32.totalorder %s288_s14, %s911_s18  ;;  %p915_p4 = scmp.lt.u32.totalorder %s1458_s1, %s911_s18 }
  0x72   : > { %p917_p6 = scmp.lt.u32.totalorder %s911_s18, %s288_s14 }
  0x73   : > { %p916_p5 = por %p915_p4, %p914_p3 }
  0x75   : > { %p918_p7 = por %p917_p6, %p916_p5 }
  0x77   : > { %p919_p8 = pnand %p918_p7, %p912_p2 }
  0x79   : > { %922 = shalt.err (!%p919_p8)  }
  0x7a   : > { %s923_s10 = scalar_lea.vmem %s298_s13, 16  ;;  %p928_p12 = scmp.lt.s32.totalorder %s298_s13, %s1442_s19 }
  0x7b   : > { %p924_p9 = scmp.ne.s32.totalorder %s298_s13, %s923_s10  ;;  %p929_p13 = scmp.lt.s32.totalorder %s1467_s17, %s923_s10 }
  0x7d   : > { %p930_p0 = por %p929_p13, %p928_p12 }
  0x7f   : > { %p931_p1 = pnand %p930_p0, %p924_p9 }
  0x81   : > { %934 = shalt.err (!%p931_p1)  }
  0x82   : > { %300 = dma.hbm_to_vmem [thread:$0]  %s288_s14, 16, %s298_s13, [#allocation3] }
  0x83   : > { %s1298_s21 = smov [#allocation2 + $0x4]   ;;  %s319_s4 = sadd.s32 5, %s1432_s28 }
  0x84   : > { %s314_s26 = sshll.u32 %s1298_s21, 4  ;;  %s1520_s5 = sld [smem:[#allocation5 + %s319_s4]]  ;;  %s315_s26 = int_to_ptr.vmem [resolvable:$true] %s314_s26 }
  0x85   : > { %s336_s27 = sadd.s32 6, %s1432_s28  ;;  %s740_s12 = sshll.u32 %s1508_s6, 4 }
  0x86   : > { %s1299_s0 = smov [#allocation2 + $0x5]   ;;  %s305_s24 = scalar_lea.hbm %s1789_s2, %s740_s12 }
  0x87   : > { %s331_s25 = sshll.u32 %s1299_s0, 4  ;;  %s935_s13 = scalar_lea.hbm %s305_s24, 16  ;;  %s1527_s25 = int_to_ptr.vmem [resolvable:$true] %s331_s25 }
  0x88   : > { %p936_p2 = scmp.ne.s32.totalorder %s305_s24, %s935_s13  ;;  %p938_p3 = scmp.lt.u32.totalorder %s305_s24, %s1789_s2 }
  0x89   : > { %p939_p4 = scmp.lt.u32.totalorder %s1458_s1, %s935_s13  ;;  %p941_p6 = scmp.lt.u32.totalorder %s935_s13, %s305_s24 }
  0x8b   : > { %p940_p5 = por %p939_p4, %p938_p3 }
  0x8d   : > { %p942_p7 = por %p941_p6, %p940_p5 }
  0x8f   : > { %p943_p8 = pnand %p942_p7, %p936_p2 }
  0x91   : > { %946 = shalt.err (!%p943_p8)  }
  0x92   : > { %s947_s6 = scalar_lea.vmem %s315_s26, 16  ;;  %p952_p12 = scmp.lt.s32.totalorder %s315_s26, %s1442_s19 }
  0x93   : > { %p948_p9 = scmp.ne.s32.totalorder %s315_s26, %s947_s6  ;;  %p953_p13 = scmp.lt.s32.totalorder %s1467_s17, %s947_s6 }
  0x95   : > { %p954_p0 = por %p953_p13, %p952_p12 }
  0x97   : > { %p955_p1 = pnand %p954_p0, %p948_p9 }
  0x99   : > { %958 = shalt.err (!%p955_p1)  }
  0x9a   : > { %317 = dma.hbm_to_vmem [thread:$0]  %s305_s24, 16, %s315_s26, [#allocation3] }
  0x9b   : > { %s1535_s21 = sld [smem:[#allocation5 + %s336_s27]]  ;;  %s741_s4 = sshll.u32 %s1520_s5, 4 }
  0x9c   : > { %s1300_s12 = smov [#allocation2 + $0x6]   ;;  %s322_s13 = scalar_lea.hbm %s1789_s2, %s741_s4 }
  0x9d   : > { %s348_s0 = sshll.u32 %s1300_s12, 4  ;;  %s959_s14 = scalar_lea.hbm %s322_s13, 16  ;;  %s1541_s0 = int_to_ptr.vmem [resolvable:$true] %s348_s0 }
  0x9e   : > { %p960_p2 = scmp.ne.s32.totalorder %s322_s13, %s959_s14  ;;  %p962_p3 = scmp.lt.u32.totalorder %s322_s13, %s1789_s2 }
  0x9f   : > { %p963_p4 = scmp.lt.u32.totalorder %s1458_s1, %s959_s14  ;;  %p965_p6 = scmp.lt.u32.totalorder %s959_s14, %s322_s13 }
  0xa1   : > { %p964_p5 = por %p963_p4, %p962_p3 }
  0xa3   : > { %p966_p7 = por %p965_p6, %p964_p5 }
  0xa5   : > { %p967_p8 = pnand %p966_p7, %p960_p2 }
  0xa7   : > { %970 = shalt.err (!%p967_p8)  }
  0xa8   : > { %s971_s26 = scalar_lea.vmem %s1527_s25, 16  ;;  %p976_p12 = scmp.lt.s32.totalorder %s1527_s25, %s1442_s19 }
  0xa9   : > { %p972_p9 = scmp.ne.s32.totalorder %s1527_s25, %s971_s26  ;;  %p977_p13 = scmp.lt.s32.totalorder %s1467_s17, %s971_s26 }
  0xab   : > { %p978_p0 = por %p977_p13, %p976_p12 }
  0xad   : > { %p979_p1 = pnand %p978_p0, %p972_p9 }
  0xaf   : > { %982 = shalt.err (!%p979_p1)  }
  0xb0   : > { %334 = dma.hbm_to_vmem [thread:$0]  %s322_s13, 16, %s1527_s25, [#allocation3] }
  0xb1   : > { %s353_s5 = sadd.s32 7, %s1432_s28  ;;  %s1301_s24 = smov [#allocation2 + $0x7]  }
  0xb2   : > { %s1554_s27 = sld [smem:[#allocation5 + %s353_s5]]  ;;  %s365_s4 = sshll.u32 %s1301_s24, 4  ;;  %s1557_s4 = int_to_ptr.vmem [resolvable:$true] %s365_s4 }
  0xb3   : > { %s742_s12 = sshll.u32 %s1535_s21, 4  ;;  %s1563_s10 = sadd.s32 8, %s1432_s28 }
  0xb4   : > { %s339_s14 = scalar_lea.hbm %s1789_s2, %s742_s12 }
  0xb5   : > { %s983_s6 = scalar_lea.hbm %s339_s14, 16  ;;  %p986_p3 = scmp.lt.u32.totalorder %s339_s14, %s1789_s2 }
  0xb6   : > { %p984_p2 = scmp.ne.s32.totalorder %s339_s14, %s983_s6  ;;  %p987_p4 = scmp.lt.u32.totalorder %s1458_s1, %s983_s6 }
  0xb7   : > { %p989_p6 = scmp.lt.u32.totalorder %s983_s6, %s339_s14 }
  0xb8   : > { %p988_p5 = por %p987_p4, %p986_p3 }
  0xba   : > { %p990_p7 = por %p989_p6, %p988_p5 }
  0xbc   : > { %p991_p8 = pnand %p990_p7, %p984_p2 }
  0xbe   : > { %994 = shalt.err (!%p991_p8)  }
  0xbf   : > { %s995_s25 = scalar_lea.vmem %s1541_s0, 16  ;;  %p1000_p12 = scmp.lt.s32.totalorder %s1541_s0, %s1442_s19 }
  0xc0   : > { %p996_p9 = scmp.ne.s32.totalorder %s1541_s0, %s995_s25  ;;  %p1001_p13 = scmp.lt.s32.totalorder %s1467_s17, %s995_s25 }
  0xc2   : > { %p1002_p0 = por %p1001_p13, %p1000_p12 }
  0xc4   : > { %p1003_p1 = pnand %p1002_p0, %p996_p9 }
  0xc6   : > { %1006 = shalt.err (!%p1003_p1)  }
  0xc7   : > { %351 = dma.hbm_to_vmem [thread:$0]  %s339_s14, 16, %s1541_s0, [#allocation3] }
  0xc8   : > { %s1576_s11 = sld [smem:[#allocation5 + %s1563_s10]]  ;;  %s1302_s28 = smov [#allocation2 + $0x8]  }
  0xc9   : > { %s389_s21 = sshll.u32 %s1302_s28, 4  ;;  %s393_s13 = sadd.s32 1, %s1563_s10  ;;  %s1580_s21 = int_to_ptr.vmem [resolvable:$true] %s389_s21 }
  0xca   : > { %s743_s5 = sshll.u32 %s1554_s27, 4  ;;  %s1585_s20 = sld [smem:[#allocation5 + %s393_s13]] }
  0xcb   : > { %s356_s18 = scalar_lea.hbm %s1789_s2, %s743_s5 }
  0xcc   : > { %s1007_s6 = scalar_lea.hbm %s356_s18, 16  ;;  %p1010_p3 = scmp.lt.u32.totalorder %s356_s18, %s1789_s2 }
  0xcd   : > { %p1008_p2 = scmp.ne.s32.totalorder %s356_s18, %s1007_s6  ;;  %p1011_p4 = scmp.lt.u32.totalorder %s1458_s1, %s1007_s6 }
  0xce   : > { %p1013_p6 = scmp.lt.u32.totalorder %s1007_s6, %s356_s18 }
  0xcf   : > { %p1012_p5 = por %p1011_p4, %p1010_p3 }
  0xd1   : > { %p1014_p7 = por %p1013_p6, %p1012_p5 }
  0xd3   : > { %p1015_p8 = pnand %p1014_p7, %p1008_p2 }
  0xd5   : > { %1018 = shalt.err (!%p1015_p8)  }
  0xd6   : > { %s1019_s0 = scalar_lea.vmem %s1557_s4, 16  ;;  %p1024_p12 = scmp.lt.s32.totalorder %s1557_s4, %s1442_s19 }
  0xd7   : > { %p1020_p9 = scmp.ne.s32.totalorder %s1557_s4, %s1019_s0  ;;  %p1025_p13 = scmp.lt.s32.totalorder %s1467_s17, %s1019_s0 }
  0xd9   : > { %p1026_p0 = por %p1025_p13, %p1024_p12 }
  0xdb   : > { %p1027_p1 = pnand %p1026_p0, %p1020_p9 }
  0xdd   : > { %1030 = shalt.err (!%p1027_p1)  }
  0xde   : > { %368 = dma.hbm_to_vmem [thread:$0]  %s356_s18, 16, %s1557_s4, [#allocation3] }
  0xdf   : > { %s410_s27 = sadd.s32 2, %s1563_s10  ;;  %s744_s14 = sshll.u32 %s1576_s11, 4 }
  0xe0   : > { %s1303_s28 = smov [#allocation2 + $0x9]   ;;  %s378_s12 = scalar_lea.hbm %s1789_s2, %s744_s14 }
  0xe1   : > { %s406_s13 = sshll.u32 %s1303_s28, 4  ;;  %s1031_s6 = scalar_lea.hbm %s378_s12, 16  ;;  %s1602_s13 = int_to_ptr.vmem [resolvable:$true] %s406_s13 }
  0xe2   : > { %p1032_p2 = scmp.ne.s32.totalorder %s378_s12, %s1031_s6  ;;  %p1034_p3 = scmp.lt.u32.totalorder %s378_s12, %s1789_s2 }
  0xe3   : > { %p1035_p4 = scmp.lt.u32.totalorder %s1458_s1, %s1031_s6  ;;  %p1037_p6 = scmp.lt.u32.totalorder %s1031_s6, %s378_s12 }
  0xe5   : > { %p1036_p5 = por %p1035_p4, %p1034_p3 }
  0xe7   : > { %p1038_p7 = por %p1037_p6, %p1036_p5 }
  0xe9   : > { %p1039_p8 = pnand %p1038_p7, %p1032_p2 }
  0xeb   : > { %1042 = shalt.err (!%p1039_p8)  }
  0xec   : > { %s1043_s4 = scalar_lea.vmem %s1580_s21, 16  ;;  %p1048_p12 = scmp.lt.s32.totalorder %s1580_s21, %s1442_s19 }
  0xed   : > { %p1044_p9 = scmp.ne.s32.totalorder %s1580_s21, %s1043_s4  ;;  %p1049_p13 = scmp.lt.s32.totalorder %s1467_s17, %s1043_s4 }
  0xef   : > { %p1050_p0 = por %p1049_p13, %p1048_p12 }
  0xf1   : > { %p1051_p1 = pnand %p1050_p0, %p1044_p9 }
  0xf3   : > { %1054 = shalt.err (!%p1051_p1)  }
  0xf4   : > { %392 = dma.hbm_to_vmem [thread:$0]  %s378_s12, 16, %s1580_s21, [#allocation3 + $0x1] }
  0xf5   : > { %s745_s11 = sshll.u32 %s1585_s20, 4  ;;  %s1615_s18 = sld [smem:[#allocation5 + %s410_s27]] }
  0xf6   : > { %s396_s28 = scalar_lea.hbm %s1789_s2, %s745_s11 }
  0xf7   : > { %s1055_s5 = scalar_lea.hbm %s396_s28, 16  ;;  %p1058_p3 = scmp.lt.u32.totalorder %s396_s28, %s1789_s2 }
  0xf8   : > { %p1056_p2 = scmp.ne.s32.totalorder %s396_s28, %s1055_s5  ;;  %p1059_p4 = scmp.lt.u32.totalorder %s1458_s1, %s1055_s5 }
  0xf9   : > { %p1061_p6 = scmp.lt.u32.totalorder %s1055_s5, %s396_s28 }
  0xfa   : > { %p1060_p5 = por %p1059_p4, %p1058_p3 }
  0xfc   : > { %p1062_p7 = por %p1061_p6, %p1060_p5 }
  0xfe   : > { %p1063_p8 = pnand %p1062_p7, %p1056_p2 }
 0x100   : > { %1066 = shalt.err (!%p1063_p8)  }
 0x101   : > { %s1067_s21 = scalar_lea.vmem %s1602_s13, 16  ;;  %p1072_p12 = scmp.lt.s32.totalorder %s1602_s13, %s1442_s19 }
 0x102   : > { %p1068_p9 = scmp.ne.s32.totalorder %s1602_s13, %s1067_s21  ;;  %p1073_p13 = scmp.lt.s32.totalorder %s1467_s17, %s1067_s21 }
 0x104   : > { %p1074_p0 = por %p1073_p13, %p1072_p12 }
 0x106   : > { %p1075_p1 = pnand %p1074_p0, %p1068_p9 }
 0x108   : > { %1078 = shalt.err (!%p1075_p1)  }
 0x109   : > { %409 = dma.hbm_to_vmem [thread:$0]  %s396_s28, 16, %s1602_s13, [#allocation3 + $0x1] }
 0x10a   : > { %s1304_s20 = smov [#allocation2 + $0xa]   ;;  %s427_s12 = sadd.s32 3, %s1563_s10 }
 0x10b   : > { %s423_s27 = sshll.u32 %s1304_s20, 4  ;;  %s428_s26 = sld [smem:[#allocation5 + %s427_s12]]  ;;  %s424_s27 = int_to_ptr.vmem [resolvable:$true] %s423_s27 }
 0x10c   : > { %s444_s25 = sadd.s32 4, %s1563_s10  ;;  %s746_s4 = sshll.u32 %s1615_s18, 4 }
 0x10d   : > { %s1305_s11 = smov [#allocation2 + $0xb]   ;;  %s413_s24 = scalar_lea.hbm %s1789_s2, %s746_s4 }
 0x10e   : > { %s440_s0 = sshll.u32 %s1305_s11, 4  ;;  %s1079_s6 = scalar_lea.hbm %s413_s24, 16  ;;  %s1636_s0 = int_to_ptr.vmem [resolvable:$true] %s440_s0 }
 0x10f   : > { %p1080_p2 = scmp.ne.s32.totalorder %s413_s24, %s1079_s6  ;;  %p1082_p3 = scmp.lt.u32.totalorder %s413_s24, %s1789_s2 }
 0x110   : > { %p1083_p4 = scmp.lt.u32.totalorder %s1458_s1, %s1079_s6  ;;  %p1085_p6 = scmp.lt.u32.totalorder %s1079_s6, %s413_s24 }
 0x112   : > { %p1084_p5 = por %p1083_p4, %p1082_p3 }
 0x114   : > { %p1086_p7 = por %p1085_p6, %p1084_p5 }
 0x116   : > { %p1087_p8 = pnand %p1086_p7, %p1080_p2 }
 0x118   : > { %1090 = shalt.err (!%p1087_p8)  }
 0x119   : > { %s1091_s13 = scalar_lea.vmem %s424_s27, 16  ;;  %p1096_p12 = scmp.lt.s32.totalorder %s424_s27, %s1442_s19 }
 0x11a   : > { %p1092_p9 = scmp.ne.s32.totalorder %s424_s27, %s1091_s13  ;;  %p1097_p13 = scmp.lt.s32.totalorder %s1467_s17, %s1091_s13 }
 0x11c   : > { %p1098_p0 = por %p1097_p13, %p1096_p12 }
 0x11e   : > { %p1099_p1 = pnand %p1098_p0, %p1092_p9 }
 0x120   : > { %1102 = shalt.err (!%p1099_p1)  }
 0x121   : > { %426 = dma.hbm_to_vmem [thread:$0]  %s413_s24, 16, %s424_s27, [#allocation3 + $0x1] }
 0x122   : > { %s1644_s18 = sld [smem:[#allocation5 + %s444_s25]]  ;;  %s747_s16 = sshll.u32 %s428_s26, 4 }
 0x123   : > { %s430_s12 = scalar_lea.hbm %s1789_s2, %s747_s16  ;;  %s1306_s4 = smov [#allocation2 + $0xc]  }
 0x124   : > { %s457_s11 = sshll.u32 %s1306_s4, 4  ;;  %s1103_s14 = scalar_lea.hbm %s430_s12, 16  ;;  %s458_s11 = int_to_ptr.vmem [resolvable:$true] %s457_s11 }
 0x125   : > { %p1104_p2 = scmp.ne.s32.totalorder %s430_s12, %s1103_s14  ;;  %p1106_p3 = scmp.lt.u32.totalorder %s430_s12, %s1789_s2 }
 0x126   : > { %p1107_p4 = scmp.lt.u32.totalorder %s1458_s1, %s1103_s14  ;;  %p1109_p6 = scmp.lt.u32.totalorder %s1103_s14, %s430_s12 }
 0x128   : > { %p1108_p5 = por %p1107_p4, %p1106_p3 }
 0x12a   : > { %p1110_p7 = por %p1109_p6, %p1108_p5 }
 0x12c   : > { %p1111_p8 = pnand %p1110_p7, %p1104_p2 }
 0x12e   : > { %1114 = shalt.err (!%p1111_p8)  }
 0x12f   : > { %s1115_s27 = scalar_lea.vmem %s1636_s0, 16  ;;  %p1120_p12 = scmp.lt.s32.totalorder %s1636_s0, %s1442_s19 }
 0x130   : > { %p1116_p9 = scmp.ne.s32.totalorder %s1636_s0, %s1115_s27  ;;  %p1121_p13 = scmp.lt.s32.totalorder %s1467_s17, %s1115_s27 }
 0x132   : > { %p1122_p0 = por %p1121_p13, %p1120_p12 }
 0x134   : > { %p1123_p1 = pnand %p1122_p0, %p1116_p9 }
 0x136   : > { %1126 = shalt.err (!%p1123_p1)  }
 0x137   : > { %443 = dma.hbm_to_vmem [thread:$0]  %s430_s12, 16, %s1636_s0, [#allocation3 + $0x1] }
 0x138   : > { %s461_s26 = sadd.s32 5, %s1563_s10  ;;  %s748_s24 = sshll.u32 %s1644_s18, 4 }
 0x139   : > { %s1660_s25 = sld [smem:[#allocation5 + %s461_s26]]  ;;  %s1307_s21 = smov [#allocation2 + $0xd]  }
 0x13a   : > { %s474_s13 = sshll.u32 %s1307_s21, 4  ;;  %s447_s20 = scalar_lea.hbm %s1789_s2, %s748_s24  ;;  %s475_s13 = int_to_ptr.vmem [resolvable:$true] %s474_s13 }
 0x13b   : > { %s478_s4 = sadd.s32 6, %s1563_s10  ;;  %s1127_s14 = scalar_lea.hbm %s447_s20, 16 }
 0x13c   : > { %p1128_p2 = scmp.ne.s32.totalorder %s447_s20, %s1127_s14  ;;  %p1130_p3 = scmp.lt.u32.totalorder %s447_s20, %s1789_s2 }
 0x13d   : > { %p1131_p4 = scmp.lt.u32.totalorder %s1458_s1, %s1127_s14  ;;  %p1133_p6 = scmp.lt.u32.totalorder %s1127_s14, %s447_s20 }
 0x13f   : > { %p1132_p5 = por %p1131_p4, %p1130_p3 }
 0x141   : > { %p1134_p7 = por %p1133_p6, %p1132_p5 }
 0x143   : > { %p1135_p8 = pnand %p1134_p7, %p1128_p2 }
 0x145   : > { %1138 = shalt.err (!%p1135_p8)  }
 0x146   : > { %s1139_s0 = scalar_lea.vmem %s458_s11, 16  ;;  %p1144_p12 = scmp.lt.s32.totalorder %s458_s11, %s1442_s19 }
 0x147   : > { %p1140_p9 = scmp.ne.s32.totalorder %s458_s11, %s1139_s0  ;;  %p1145_p13 = scmp.lt.s32.totalorder %s1467_s17, %s1139_s0 }
 0x149   : > { %p1146_p0 = por %p1145_p13, %p1144_p12 }
 0x14b   : > { %p1147_p1 = pnand %p1146_p0, %p1140_p9 }
 0x14d   : > { %1150 = shalt.err (!%p1147_p1)  }
 0x14e   : > { %460 = dma.hbm_to_vmem [thread:$0]  %s447_s20, 16, %s458_s11, [#allocation3 + $0x1] }
 0x14f   : > { %s1673_s18 = sld [smem:[#allocation5 + %s478_s4]]  ;;  %s495_s12 = sadd.s32 7, %s1563_s10 }
 0x150   : > { %s749_s27 = sshll.u32 %s1660_s25, 4  ;;  %s1308_s26 = smov [#allocation2 + $0xe]  }
 0x151   : > { %s491_s24 = sshll.u32 %s1308_s26, 4  ;;  %s464_s28 = scalar_lea.hbm %s1789_s2, %s749_s27  ;;  %s492_s24 = int_to_ptr.vmem [resolvable:$true] %s491_s24 }
 0x152   : > { %s1680_s14 = sld [smem:[#allocation5 + %s495_s12]]  ;;  %s1151_s5 = scalar_lea.hbm %s464_s28, 16 }
 0x153   : > { %p1152_p2 = scmp.ne.s32.totalorder %s464_s28, %s1151_s5  ;;  %p1154_p3 = scmp.lt.u32.totalorder %s464_s28, %s1789_s2 }
 0x154   : > { %p1155_p4 = scmp.lt.u32.totalorder %s1458_s1, %s1151_s5  ;;  %p1157_p6 = scmp.lt.u32.totalorder %s1151_s5, %s464_s28 }
 0x156   : > { %p1156_p5 = por %p1155_p4, %p1154_p3 }
 0x158   : > { %p1158_p7 = por %p1157_p6, %p1156_p5 }
 0x15a   : > { %p1159_p8 = pnand %p1158_p7, %p1152_p2 }
 0x15c   : > { %1162 = shalt.err (!%p1159_p8)  }
 0x15d   : > { %s1163_s10 = scalar_lea.vmem %s475_s13, 16  ;;  %p1168_p12 = scmp.lt.s32.totalorder %s475_s13, %s1442_s19 }
 0x15e   : > { %p1164_p9 = scmp.ne.s32.totalorder %s475_s13, %s1163_s10  ;;  %p1169_p13 = scmp.lt.s32.totalorder %s1467_s17, %s1163_s10 }
 0x160   : > { %p1170_p0 = por %p1169_p13, %p1168_p12 }
 0x162   : > { %p1171_p1 = pnand %p1170_p0, %p1164_p9 }
 0x164   : > { %1174 = shalt.err (!%p1171_p1)  }
 0x165   : > { %477 = dma.hbm_to_vmem [thread:$0]  %s464_s28, 16, %s475_s13, [#allocation3 + $0x1] }
 0x166   : > { %s750_s25 = sshll.u32 %s1673_s18, 4  ;;  %s1309_s20 = smov [#allocation2 + $0xf]  }
 0x167   : > { %s508_s4 = sshll.u32 %s1309_s20, 4  ;;  %s481_s27 = scalar_lea.hbm %s1789_s2, %s750_s25  ;;  %s1692_s4 = int_to_ptr.vmem [resolvable:$true] %s508_s4 }
 0x168   : > { %s1175_s26 = scalar_lea.hbm %s481_s27, 16  ;;  %p1178_p3 = scmp.lt.u32.totalorder %s481_s27, %s1789_s2 }
 0x169   : > { %p1176_p2 = scmp.ne.s32.totalorder %s481_s27, %s1175_s26  ;;  %p1179_p4 = scmp.lt.u32.totalorder %s1458_s1, %s1175_s26 }
 0x16a   : > { %p1181_p6 = scmp.lt.u32.totalorder %s1175_s26, %s481_s27 }
 0x16b   : > { %p1180_p5 = por %p1179_p4, %p1178_p3 }
 0x16d   : > { %p1182_p7 = por %p1181_p6, %p1180_p5 }
 0x16f   : > { %p1183_p8 = pnand %p1182_p7, %p1176_p2 }
 0x171   : > { %1186 = shalt.err (!%p1183_p8)  }
 0x172   : > { %s1187_s13 = scalar_lea.vmem %s492_s24, 16  ;;  %p1192_p12 = scmp.lt.s32.totalorder %s492_s24, %s1442_s19 }
 0x173   : > { %p1188_p9 = scmp.ne.s32.totalorder %s492_s24, %s1187_s13  ;;  %p1193_p13 = scmp.lt.s32.totalorder %s1467_s17, %s1187_s13 }
 0x175   : > { %p1194_p0 = por %p1193_p13, %p1192_p12 }
 0x177   : > { %p1195_p1 = pnand %p1194_p0, %p1188_p9 }
 0x179   : > { %1198 = shalt.err (!%p1195_p1)  }
 0x17a   : > { %494 = dma.hbm_to_vmem [thread:$0]  %s481_s27, 16, %s492_s24, [#allocation3 + $0x1] }
 0x17b   : > { %s751_s18 = sshll.u32 %s1680_s14, 4 }
 0x17c   : > { %s498_s6 = scalar_lea.hbm %s1789_s2, %s751_s18 }
 0x17d   : > { %s1199_s11 = scalar_lea.hbm %s498_s6, 16  ;;  %p1202_p3 = scmp.lt.u32.totalorder %s498_s6, %s1789_s2 }
 0x17e   : > { %p1200_p2 = scmp.ne.s32.totalorder %s498_s6, %s1199_s11  ;;  %p1203_p4 = scmp.lt.u32.totalorder %s1458_s1, %s1199_s11 }
 0x17f   : > { %p1205_p6 = scmp.lt.u32.totalorder %s1199_s11, %s498_s6 }
 0x180   : > { %p1204_p5 = por %p1203_p4, %p1202_p3 }
 0x182   : > { %p1206_p7 = por %p1205_p6, %p1204_p5 }
 0x184   : > { %p1207_p8 = pnand %p1206_p7, %p1200_p2 }
 0x186   : > { %1210 = shalt.err (!%p1207_p8)  }
 0x187   : > { %s1211_s24 = scalar_lea.vmem %s1692_s4, 16  ;;  %p1216_p12 = scmp.lt.s32.totalorder %s1692_s4, %s1442_s19 }
 0x188   : > { %p1212_p9 = scmp.ne.s32.totalorder %s1692_s4, %s1211_s24  ;;  %p1217_p13 = scmp.lt.s32.totalorder %s1467_s17, %s1211_s24 }
 0x18a   : > { %p1218_p0 = por %p1217_p13, %p1216_p12 }
 0x18c   : > { %p1219_p1 = pnand %p1218_p0, %p1212_p9 }
 0x18e   : > { %1222 = shalt.err (!%p1219_p1)  }
 0x18f   : > { %511 = dma.hbm_to_vmem [thread:$0]  %s498_s6, 16, %s1692_s4, [#allocation3 + $0x1] }
 0x190   : > { %s1715_s1 = scalar_lea.vmem [#allocation6], %s1419_s23 }
 0x191   : > { %1269 = dma.done.wait [#allocation3], 128 }
 0x192   : > { %1270 = vsyncadd [#allocation3], 4294967168  ;;  %v1310_v5 = vmov 0   ;;  %v517_v6 = vld [vmem:[%s1440_s22] sm:$0xff]  ;;  %v524_v8 = vlaneseq }
 0x193   : > { %821 = vset.pattern.permute.xlu0 %v1310_v5  ;;  %v518_v7 = vcvt.s32.f32 %v517_v6  ;;  %v515_v12 = vld [vmem:[#allocation2] sm:$0xff] }
 0x194   : > { %v525_v9 = vshrl.u32 %v524_v8, 7  ;;  %v516_v13 = vld [vmem:[%s1790_s3] sm:$0xff] }
 0x195   : > { %521 = vperm.xlu0 %821, %v518_v7   ;;  %v534_v17 = vadd.f32 %v516_v13, %v515_v12 }
 0x196   : > { %v526_v10 = vsub.s32 0, %v525_v9 }
 0x198   : > { %v527_v11 = vrot.slane %v373_v4, %v526_v10  ;;  %v532_v14 = vrot.slane %v1424_v2, %v526_v10 }
 0x214   : > { %v522_v15 = vpop.permute.xlu0 %521 }
 0x215   : > { %v528_v16 = vmul.f32 %v527_v11, %v522_v15 }
 0x217   : > { %v533_v18 = vadd.f32 %v532_v14, %v528_v16 }
 0x219   : > { %v535_v19 = vadd.f32 %v534_v17, %v533_v18 }
 0x21b   : > { %536 = vadd.xlane.f32.xlu0 %v535_v19 }
 0x2a8   : > { %v537_v20 = vpop.xlane.xlu0 %536 }
 0x2a9   : > { %v538_v21 = vmul.f32 0.0078125, %v537_v20 }
 0x2ab   : > { %v539_v22 = vsub.f32 %v535_v19, %v538_v21 }
 0x2ad   : > { %v540_v23 = vmul.f32 %v539_v22, %v539_v22 }
 0x2af   : > { %541 = vadd.xlane.f32.xlu1 %v540_v23 }
 0x33c   : > { %v542_v24 = vpop.xlane.xlu1 %541 }
 0x33d   : > { %v543_v25 = vmul.f32 0.0078125, %v542_v24 }
 0x33f   : > { %v544_v26 = vadd.f32 1e-12, %v543_v25 }
 0x341   : > { %822 = vrsqrt.f32 %v544_v26 }
 0x34b   : > { %v823_v27 = vpop.eup %822 }
 0x34c   : > { %v546_v28 = vmul.f32 %v823_v27, %v539_v22 }
 0x34e   : > { %v553_v29 = vmul.f32 %v1410_v0, %v546_v28 }
 0x350   : > { %v560_v30 = vadd.f32 %v1415_v1, %v553_v29 }
 0x352   : > { %561 = vst [vmem:[%s1715_s1] sm:$0xff] %v560_v30 }
 0x353   : > { %1271 = dma.done.wait [#allocation3 + $0x1], 128 }
 0x354   : > { %1272 = vsyncadd [#allocation3 + $0x1], 4294967168  ;;  %824 = vset.pattern.permute.xlu0 %v1310_v5  ;;  %v567_v31 = vld [vmem:[%s1440_s22 + $0x8] sm:$0xff]  ;;  %s761_s22 = sshll.u32 %s1378_s9, 8  ;;  %s606_s20 = sshll.u32 %s1715_s1, 4  ;;  %s1740_s20 = int_to_ptr.vmem [resolvable:$true] %s606_s20 }
 0x355   : > { %v568_v32 = vcvt.s32.f32 %v567_v31  ;;  %v565_v33 = vld [vmem:[#allocation2 + $0x8] sm:$0xff]  ;;  %s1738_s12 = scalar_lea.hbm %s1794_s7, %s761_s22  ;;  %s1814_s27 = sand.u32 1, %s1283_s30  }
 0x356   : > { %v566_v34 = vld [vmem:[%s1790_s3 + $0x8] sm:$0xff]  ;;  %s1746_s26 = scalar_lea.sflag [#allocation7], %s1814_s27  ;;  %s1223_s9 = scalar_lea.vmem %s1740_s20, 256 }
 0x357   : > { %571 = vperm.xlu0 %824, %v568_v32   ;;  %v576_v37 = vadd.f32 %v566_v34, %v565_v33  ;;  %p1224_p2 = scmp.ne.s32.totalorder %s1740_s20, %s1223_s9  ;;  %s1311_s21 = smov [#allocation6]  }
 0x358   : > { %s1227_s16 = sshll.u32 %s1311_s21, 4  ;;  %s1228_s16 = int_to_ptr.vmem [resolvable:$false] %s1227_s16 }
 0x359   : > { %p1225_p3 = pnand %p1224_p2, %p1395_p10  ;;  %s1229_s13 = scalar_lea.vmem %s1228_s16, 512 }
 0x35a   : > { %p1230_p5 = scmp.lt.s32.totalorder %s1740_s20, %s1228_s16  ;;  %p1231_p6 = scmp.lt.s32.totalorder %s1229_s13, %s1223_s9 }
 0x35b   : > { %p1226_p4 = pneg %p1225_p3 }
 0x35c   : > { %p1232_p7 = por %p1231_p6, %p1230_p5 }
 0x35e   : > { %p1233_p8 = pnand %p1232_p7, %p1226_p4 }
 0x3d6   : > { %v572_v35 = vpop.permute.xlu0 %571 }
 0x3d7   : > { %v574_v36 = vmul.f32 %v572_v35, %v527_v11 }
 0x3d9   : > { %v575_v38 = vadd.f32 %v574_v36, %v532_v14 }
 0x3db   : > { %v577_v39 = vadd.f32 %v576_v37, %v575_v38 }
 0x3dd   : > { %578 = vadd.xlane.f32.xlu0 %v577_v39 }
 0x46a   : > { %v579_v40 = vpop.xlane.xlu0 %578 }
 0x46b   : > { %v580_v41 = vmul.f32 0.0078125, %v579_v40 }
 0x46d   : > { %v581_v42 = vsub.f32 %v577_v39, %v580_v41 }
 0x46f   : > { %v582_v43 = vmul.f32 %v581_v42, %v581_v42 }
 0x471   : > { %583 = vadd.xlane.f32.xlu1 %v582_v43 }
 0x4fe   : > { %v584_v44 = vpop.xlane.xlu1 %583 }
 0x4ff   : > { %v585_v45 = vmul.f32 0.0078125, %v584_v44 }
 0x501   : > { %v586_v46 = vadd.f32 1e-12, %v585_v45 }
 0x503   : > { %825 = vrsqrt.f32 %v586_v46 }
 0x50d   : > { %v826_v47 = vpop.eup %825 }
 0x50e   : > { %v588_v48 = vmul.f32 %v826_v47, %v581_v42 }
 0x510   : > { %v589_v49 = vmul.f32 %v1410_v0, %v588_v48 }
 0x512   : > { %v590_v50 = vadd.f32 %v1415_v1, %v589_v49 }
 0x514   : > { %591 = vst [vmem:[%s1715_s1 + $0x8] sm:$0xff] %v590_v50 }
 0x515   : > { %1236 = shalt.err (!%p1233_p8)
}
 0x516   : > { %s1237_s18 = scalar_lea.hbm %s1738_s12, 256  ;;  %s1241_s6 = scalar_lea.hbm %s1794_s7, 512 }
 0x517   : > { %p1238_p9 = scmp.ne.s32.totalorder %s1738_s12, %s1237_s18  ;;  %p1242_p0 = scmp.lt.u32.totalorder %s1738_s12, %s1794_s7 }
 0x518   : > { %p1243_p1 = scmp.lt.u32.totalorder %s1241_s6, %s1237_s18  ;;  %p1245_p3 = scmp.lt.u32.totalorder %s1237_s18, %s1738_s12 }
 0x519   : > { %p1239_p12 = pnand %p1238_p9, %p1395_p10 }
 0x51a   : > { %p1244_p2 = por %p1243_p1, %p1242_p0 }
 0x51b   : > { %p1240_p13 = pneg %p1239_p12 }
 0x51c   : > { %p1246_p4 = por %p1245_p3, %p1244_p2 }
 0x51e   : > { %p1247_p5 = pnand %p1246_p4, %p1240_p13 }
 0x520   : > { %1250 = shalt.err (!%p1247_p5)
}
 0x521   : > { %s1312_s25 = smov 128   ;;  %s1313_s24 = smov 8  }
 0x522   : > { %762 = dma.vmem_to_hbm [thread:$0]  (%p1395_p10), %s1740_s20, 256, %s1738_s12, %s1746_s26, %s1312_s25, %s1312_s25, %s1313_s24  }
 0x523 PF: > { %p768_p6 = scmp.ge.s32.totalorder %s1291_s8, 2  ;;  %s621_s19 = sand.u32 1, %s1279_s29  }
 0x524   : > { %s622_s17 = scalar_lea.sflag [#allocation7], %s621_s19 }
 0x525   : > { %p765_p7 = pnand %p768_p6, %p1399_p11 }
 0x527   : > { %1274 = dma.done.wait (!%p765_p7), %s622_s17, 256  }
 0x528   : > { %1276 = vsyncadd (!%p765_p7), %s622_s17, 4294967040  ;;  %s1816_s8 = sld [smem:[#allocation47_spill]]  ;;  %s1817_s23 = sld [smem:[#allocation46_spill]] }
 0x529   : > { %s1818_s0 = sld [smem:[#allocation48_spill]]  ;;  %s1819_s29 = smov %s1283_s30 }
 0x52e   : > { %p23_p8 = scmp.ge.s32.totalorder %s1816_s8, 4   ;;  %s1820_s30 = smov %s1817_s23 }
 0x530   :  { %25 = sbr.rel (!%p23_p8) target bundleno = 20 (0x14), region = 173 }
 0x537   :  { %627 = vsyncpa [#allocation7], 1 }
 0x538   :  { %629 = vsyncpa [#allocation7 + $0x1], 1 }
 0x539   :  { %630 = vsyncmov [#allocation3] }
 0x53c   :  { %s631_s15 = vpop.sfrf %630 }
 0x53d   :  { %p759_p10 = scmp.ne.s32.totalorder %s631_s15, 0 }
 0x53f   :  { %635 = shalt.err (%p759_p10)  }
 0x540   :  { %637 = vsyncmov [#allocation3 + $0x1] }
 0x543   :  { %s638_s14 = vpop.sfrf %637 }
 0x544   :  { %p760_p11 = scmp.ne.s32.totalorder %s638_s14, 0 }
 0x546   :  { %642 = shalt.err (%p760_p11)  }

</bundles_post_ra>
